<compile_context>
chip_gen: v7x
topology: tpu7x:2x2x1
jax: 0.10.0
libtpu: 0.0.40
codegen_flags: <defaults>
</compile_context>

<pallas_src>
import jax
import jax.numpy as jnp
from jax.experimental import pallas as pl
from jax.experimental.pallas import tpu as pltpu


TILE_CO = 384   # lanes per Cout tile (multiple of 128); 726 -> 768 = 2 tiles
CIN_ALIGN = 16  # bf16 sublane packing on the contraction dim


def conv1x1_relu_kernel(x_ref, wt_ref, b_ref, o_ref):
    # x_ref : [Mp, Cin_pad]        bf16 (batch rows, padded to sublane multiple)
    # wt_ref: [Cin_pad, TILE_CO]   bf16 (contiguous pre-tiled weight slab)
    # b_ref : [1, TILE_CO]         f32
    # o_ref : [Mp, TILE_CO]        f32
    acc = jnp.dot(x_ref[...], wt_ref[...], preferred_element_type=jnp.float32)
    acc = acc + b_ref[...]                 # broadcast bias over batch rows
    o_ref[...] = jnp.maximum(acc, 0.0)     # ReLU


def prepare_params(weight, bias):
    """One-time (non-hot-path) weight prep.

    weight: [Cout, Cin, 1, 1] f32 -> wt_tiled: [n_tiles, Cin_pad, TILE_CO] bf16
                                     (each tile is a contiguous HBM slab)
    bias  : [Cout]            f32 -> b_pad   : [1, Cout_pad] f32
    """
    Cout, Cin = weight.shape[0], weight.shape[1]
    Cin_pad = -(-Cin // CIN_ALIGN) * CIN_ALIGN          # 2904 -> 2912
    Cout_pad = -(-Cout // TILE_CO) * TILE_CO            # 726  -> 768
    n_tiles = Cout_pad // TILE_CO

    w2d = weight.reshape(Cout, Cin).astype(jnp.float32)            # [Cout, Cin]
    w_pad = jnp.zeros((Cout_pad, Cin_pad), jnp.float32).at[:Cout, :Cin].set(w2d)
    wt = w_pad.T.astype(jnp.bfloat16)                               # [Cin_pad, Cout_pad]
    # [Cin_pad, n_tiles, TILE_CO] -> [n_tiles, Cin_pad, TILE_CO]: contiguous tiles.
    wt_tiled = wt.reshape(Cin_pad, n_tiles, TILE_CO).transpose(1, 0, 2)

    b_pad = jnp.zeros((1, Cout_pad), jnp.float32).at[0, :Cout].set(
        bias.astype(jnp.float32)
    )
    return wt_tiled, b_pad


def conv2d_1x1_relu(x_nchw, wt_tiled, b_pad, cout):
    """x_nchw: [N, Cin, 1, 1]; wt_tiled: [n_tiles, Cin_pad, TILE_CO] bf16."""
    N, Cin, H, W = x_nchw.shape
    assert H == 1 and W == 1, "this kernel implements the 1x1-spatial case"
    n_tiles, Cin_pad, tile_co = wt_tiled.shape
    Cout_pad = n_tiles * tile_co
    assert Cin_pad >= Cin and tile_co % 128 == 0

    # Flatten NCHW -> [N, Cin]; pad batch rows to sublane multiple (8) and
    # Cin to the same padded contraction dim as the weight (zero padding).
    Mp = max(8, -(-N // 8) * 8)
    x2d = x_nchw.reshape(N, Cin).astype(jnp.bfloat16)
    x_pad = jnp.zeros((Mp, Cin_pad), jnp.bfloat16).at[:N, :Cin].set(x2d)

    cost = pl.CostEstimate(
        flops=2 * Mp * Cin_pad * Cout_pad,
        transcendentals=0,
        bytes_accessed=(
            Cin_pad * Cout_pad * 2      # bf16 weight (dominant)
            + Mp * Cin_pad * 2          # bf16 input
            + Cout_pad * 4              # f32 bias
            + Mp * Cout_pad * 4         # f32 output
        ),
    )

    out_pad = pl.pallas_call(
        conv1x1_relu_kernel,
        out_shape=jax.ShapeDtypeStruct((Mp, Cout_pad), jnp.float32),
        grid=(n_tiles,),
        in_specs=[
            # Input is reused across tiles (same block every step).
            pl.BlockSpec((Mp, Cin_pad), lambda j: (0, 0)),
            # Contiguous per-tile weight slab; leading tile dim is squeezed out.
            pl.BlockSpec((pl.Squeezed(), Cin_pad, tile_co), lambda j: (j, 0, 0)),
            pl.BlockSpec((1, tile_co), lambda j: (0, j)),
        ],
        out_specs=pl.BlockSpec((Mp, tile_co), lambda j: (0, j)),
        compiler_params=pltpu.CompilerParams(
            # 2 independent Cout tiles -> one per TensorCore on v7x;
            # harmless sequential loop on v5e/v6e.
            dimension_semantics=("parallel",),
        ),
        cost_estimate=cost,
    )(x_pad, wt_tiled, b_pad)

    return out_pad[:N, :cout].reshape(N, cout, 1, 1)


if __name__ == "__main__":
    N, Cin, Cout = 1, 2904, 726

    key = jax.random.PRNGKey(0)
    kx, kw, kb = jax.random.split(key, 3)

    # Deterministic synthetic parameters / input (module shapes from __init__).
    x = jax.random.normal(kx, (N, Cin, 1, 1), dtype=jnp.float32)
    weight = jax.random.normal(kw, (Cout, Cin, 1, 1), dtype=jnp.float32) * 0.02
    bias = jax.random.normal(kb, (Cout,), dtype=jnp.float32) * 0.02

    # One-time parameter prep (outside the hot path).
    wt_tiled, b_pad = prepare_params(weight, bias)

    out = conv2d_1x1_relu(x, wt_tiled, b_pad, Cout)
    out = jax.block_until_ready(out)
    assert out.shape == (N, Cout, 1, 1)

    # Reference with the same bf16 input/weight quantization, f32 accumulation.
    x_bf = x.reshape(N, Cin).astype(jnp.bfloat16).astype(jnp.float32)
    w_bf = weight.reshape(Cout, Cin).astype(jnp.bfloat16).astype(jnp.float32)
    ref_bf = jnp.maximum(x_bf @ w_bf.T + bias, 0.0).reshape(N, Cout, 1, 1)
    assert jnp.allclose(out, ref_bf, atol=1e-3, rtol=1e-3)

    # Looser sanity check against the full-f32 math of the original module.
    ref_f32 = jnp.maximum(
        x.reshape(N, Cin) @ weight.reshape(Cout, Cin).T + bias, 0.0
    ).reshape(N, Cout, 1, 1)
    assert jnp.allclose(out, ref_f32, atol=5e-2, rtol=5e-2)

    print("KERNEL_OK")
</pallas_src>

<mosaic_0001>
module attributes {stable_mosaic.version = 11 : i64} {
  func.func @conv1x1_relu_kernel(%arg0: i32, %arg1: memref<8x2912xbf16, #tpu.memory_space<vmem>>, %arg2: memref<1x2912x384xbf16, #tpu.memory_space<vmem>>, %arg3: memref<1x384xf32, #tpu.memory_space<vmem>>, %arg4: memref<8x384xf32, #tpu.memory_space<vmem>>) attributes {dimension_semantics = [#tpu.dimension_semantics<parallel>], iteration_bounds = array<i64: 2>, scalar_prefetch = 0 : i64, scratch_operands = 0 : i64, tpu.core_type = #tpu.core_type<tc>, window_params = [{pipeline_mode = #tpu.pipeline_mode<synchronous>, transform_indices = @transform_0, window_bounds = array<i64: 8, 2912>}, {transform_indices = @transform_1, window_bounds = array<i64: 1, 2912, 384>}, {transform_indices = @transform_2, window_bounds = array<i64: 1, 384>}, {transform_indices = @transform_3, window_bounds = array<i64: 8, 384>}]} {
    %c0 = arith.constant 0 : index
    %c0_0 = arith.constant 0 : index
    %0 = vector.load %arg1[%c0, %c0_0] : memref<8x2912xbf16, #tpu.memory_space<vmem>>, vector<8x2912xbf16>
    %c0_1 = arith.constant 0 : index
    %c0_2 = arith.constant 0 : index
    %c0_3 = arith.constant 0 : index
    %1 = vector.load %arg2[%c0_1, %c0_2, %c0_3] : memref<1x2912x384xbf16, #tpu.memory_space<vmem>>, vector<1x2912x384xbf16>
    %2 = vector.shape_cast %1 : vector<1x2912x384xbf16> to vector<2912x384xbf16>
    %cst = arith.constant dense<0.000000e+00> : vector<8x384xf32>
    %3 = tpu.matmul %0, %2, %cst {dimension_numbers = #tpu.dot_dimension_numbers<[1], [0], [0], [1], [0, 0, 1, 1], [], []>} : vector<8x2912xbf16>, vector<2912x384xbf16>, vector<8x384xf32> -> vector<8x384xf32>
    %c0_4 = arith.constant 0 : index
    %c0_5 = arith.constant 0 : index
    %4 = vector.load %arg3[%c0_4, %c0_5] : memref<1x384xf32, #tpu.memory_space<vmem>>, vector<1x384xf32>
    %5 = vector.broadcast %4 : vector<1x384xf32> to vector<8x384xf32>
    %6 = arith.addf %3, %5 : vector<8x384xf32>
    %cst_6 = arith.constant 0.000000e+00 : f32
    %7 = vector.broadcast %cst_6 : f32 to vector<8x384xf32>
    %8 = arith.maximumf %6, %7 : vector<8x384xf32>
    %c0_7 = arith.constant 0 : index
    %c0_8 = arith.constant 0 : index
    %9 = vector.load %arg4[%c0_7, %c0_8] : memref<8x384xf32, #tpu.memory_space<vmem>>, vector<8x384xf32>
    tpu.vector_store %arg4[%c0_7, %c0_8], %8 {strides = array<i32>} : memref<8x384xf32, #tpu.memory_space<vmem>>, vector<8x384xf32>,
    return
  }
  func.func @transform_0(%arg0: i32) -> (i32, i32) {
    %c0_i32 = arith.constant 0 : i32
    %c0_i32_0 = arith.constant 0 : i32
    %c0_i32_1 = arith.constant 0 : i32
    return %c0_i32, %c0_i32_0 : i32, i32
  }
  func.func @transform_1(%arg0: i32) -> (i32, i32, i32) {
    %c0_i32 = arith.constant 0 : i32
    %c0_i32_0 = arith.constant 0 : i32
    %c0_i32_1 = arith.constant 0 : i32
    return %arg0, %c0_i32, %c0_i32_0 : i32, i32, i32
  }
  func.func @transform_2(%arg0: i32) -> (i32, i32) {
    %c0_i32 = arith.constant 0 : i32
    %c0_i32_0 = arith.constant 0 : i32
    return %c0_i32, %arg0 : i32, i32
  }
  func.func @transform_3(%arg0: i32) -> (i32, i32) {
    %c0_i32 = arith.constant 0 : i32
    %c0_i32_0 = arith.constant 0 : i32
    return %c0_i32, %arg0 : i32, i32
  }
}

</mosaic_0001>

<bundles_post_ra>
// kernel: tpu_custom_call.1
= control target key start
LH: loop header
LB: loop body
LE: loop exit
PB: predicated region body
PF: predicated region fallthrough
CT: control target
= control target key end

     0   :  { %8 = vsyncpa [#allocation3], 0  ;;  %s7946_s0 = inlined_call_operand.hbm [shape: bf16[8,2912], index: 0, kind: input, shape index: {}]   ;;  %s7947_s1 = inlined_call_operand.hbm [shape: bf16[2,2912,384], index: 1, kind: input, shape index: {}]   ;;  %s7948_s2 = inlined_call_operand.hbm [shape: f32[1,768], index: 2, kind: input, shape index: {}]   ;;  %s7949_s3 = inlined_call_operand.hbm [shape: f32[8,768], index: 3, kind: output, shape index: {}]  }
   0x1   :  { %9 = vsyncpa [#allocation6], 0 }
   0x2   :  { %11 = vsyncpa [#allocation6 + $0x1], 0 }
   0x3   :  { %12 = vsyncpa [#allocation4], 0 }
   0x4   :  { %14 = vsyncpa [#allocation4 + $0x1], 0  ;;  %s6994_s12 = smov 0   ;;  %s6996_s13 = smov 0  }
   0x5   :  { %s6998_s14 = smov 0   ;;  %s7000_s15 = smov 0  }
   0x6 LB: > { %s7015_s16 = sadd.s32 1, %s6963_s15   ;;  %s48_s17 = sadd.s32 1, %s6959_s14  ;;  %s6963_s15 = sphi %s7000_s15, %s7976_s15   ;;  %s6959_s14 = sphi %s6998_s14, %s7975_s14   ;;  %s6955_s13 = sphi %s6996_s13, %s7974_s13   ;;  %s6951_s12 = sphi %s6994_s12, %s7973_s12  }
   0x7   : > { %s45_s18 = ssub.s32 %s6963_s15, %s7015_s16  ;;  %p55_p0 = scmp.ne.s32.totalorder %s6959_s14, %s6955_s13 }
   0x8   : > { %p46_p1 = scmp.eq.s32.totalorder %s45_s18, 0  ;;  %p56_p2 = scmp.eq.s32.totalorder %s6963_s15, 0 }
   0x9   : > { %p6013_p4 = scmp.lt.s32.totalorder %s6963_s15, 2  ;;  %s148_s20 = sand.u32 1, %s6963_s15  }
   0xa   : > { %s7026_s19 = scalar_select %p46_p1, %s6959_s14, %s48_s17  }
   0xb   : > { %p57_p5 = por %p56_p2, %p55_p0  ;;  %s150_s21 = sand.u32 1, %s6959_s14  }
   0xc   : > { %s5981_s22 = smul.u32 4368, %s150_s21  ;;  %s7047_s30 = scalar_lea.sflag [#allocation6], %s148_s20 }
   0xd   : > { %p7035_p6 = pnand %p6013_p4, %p57_p5  ;;  %s5982_s24 = smul.u32 69888, %s6963_s15 }
   0xe   : > { %s152_s28 = scalar_lea.vmem [#allocation5], %s5981_s22  ;;  %s6810_s7 = scalar_lea.hbm %s7947_s1, 139776 }
   0xf   : > { %s7957_s23 = scalar_select %p7035_p6, 1, 0 }
  0x10   : > { %s7043_s27 = scalar_lea.hbm %s7947_s1, %s5982_s24  ;;  %s159_s29 = sshll.u32 %s152_s28, 4  ;;  %s7045_s29 = int_to_ptr.vmem [resolvable:$true] %s159_s29 }
  0x11   : > { %s6805_s4 = scalar_lea.hbm %s7043_s27, 69888  ;;  %p7951_p8 = pneg %p7035_p6 }
  0x12   : > { %p6806_p7 = scmp.ne.s32.totalorder %s7043_s27, %s6805_s4  ;;  %p6811_p11 = scmp.lt.u32.totalorder %s7043_s27, %s7947_s1 }
  0x13   : > { %p6812_p12 = scmp.lt.u32.totalorder %s6810_s7, %s6805_s4  ;;  %p6814_p1 = scmp.lt.u32.totalorder %s6805_s4, %s7043_s27 }
  0x14   : > { %p6808_p9 = pnand %p7951_p8, %p6806_p7 }
  0x15   : > { %p6813_p13 = por %p6812_p12, %p6811_p11 }
  0x16   : > { %p6809_p10 = pneg %p6808_p9 }
  0x17   : > { %p6815_p2 = por %p6814_p1, %p6813_p13 }
  0x19   : > { %p6816_p4 = pnand %p6815_p2, %p6809_p10 }
  0x1b   : > { %6819 = shalt.err (!%p6816_p4)
}
  0x1c   : > { %s6820_s10 = scalar_lea.vmem %s7045_s29, 69888  ;;  %s6965_s11 = smov [#allocation5]  }
  0x1d   : > { %p6821_p5 = scmp.ne.s32.totalorder %s7045_s29, %s6820_s10  ;;  %s6825_s17 = sshll.u32 %s6965_s11, 4  ;;  %s6826_s17 = int_to_ptr.vmem [resolvable:$false] %s6825_s17 }
  0x1e   : > { %s6827_s18 = scalar_lea.vmem %s6826_s17, 139776  ;;  %p6828_p3 = scmp.lt.s32.totalorder %s7045_s29, %s6826_s17 }
  0x1f   : > { %p6823_p7 = pnand %p6821_p5, %p7951_p8  ;;  %p6829_p11 = scmp.lt.s32.totalorder %s6827_s18, %s6820_s10 }
  0x21   : > { %p6824_p9 = pneg %p6823_p7  ;;  %p6830_p12 = por %p6829_p11, %p6828_p3 }
  0x23   : > { %p6831_p13 = pnand %p6830_p12, %p6824_p9 }
  0x25   : > { %6834 = shalt.err (!%p6831_p13)
}
  0x26   : > { %s6966_s20 = smov 192   ;;  %s6967_s22 = smov 12  }
  0x27   : > { %6004 = dma.hbm_to_vmem [thread:$0]  (!%p7035_p6), %s7043_s27, 69888, %s7045_s29, %s7047_s30, %s6966_s20, %s6966_s20, %s6967_s22  }
  0x28   : > { %s7076_s24 = sadd.s32 4294967295, %s6963_s15   ;;  %s5088_s25 = sadd.s32 4294967294, %s6963_s15  }
  0x29   : > { %p61_p3 = scmp.ne.s32.totalorder %s6955_s13, %s6951_s12  ;;  %p7950_p10 = scmp.eq.s32.totalorder %s7076_s24, 0 }
  0x2a   : > { %p111_p1 = scmp.eq.s32.totalorder %s7076_s24, 1  ;;  %p117_p2 = scmp.eq.s32.totalorder %s5088_s25, 1 }
  0x2b   : > { %p7085_p4 = por %p7950_p10, %p61_p3  ;;  %p5089_p5 = scmp.ge.s32.totalorder %s6963_s15, 1 }
  0x2c   : > { %p7093_p7 = por %p111_p1, %p55_p0  ;;  %p7097_p9 = por %p117_p2, %p61_p3 }
  0x2d   : > { %s7958_s26 = scalar_select %p7085_p4, 1, 0 }
  0x2e   : > { %s7959_s27 = scalar_select %p7093_p7, 1, 0 }
  0x2f   : > { %s7960_s28 = scalar_select %p7097_p9, 1, 0 }
  0x30   : > { %p124_p11 = scmp.lt.s32.totalorder %s6963_s15, 3  ;;  %s5983_s29 = smul.u32 3, %s150_s21 }
  0x31   : > { %s6968_s5 = smov [#allocation2]   ;;  %s5670_s7 = smul.u32 48, %s6963_s15 }
  0x32   : > { %p7104_p12 = pnand %p5089_p5, %p124_p11  ;;  %s137_s6 = sshll.u32 %s6968_s5, 4  ;;  %s138_s6 = int_to_ptr.vmem [resolvable:$true] %s137_s6 }
  0x33   : > { %s173_s8 = scalar_lea.vmem [#allocation7], %s5983_s29  ;;  %s7120_s17 = scalar_lea.hbm %s7948_s2, %s5670_s7 }
  0x34   : > { %s7961_s4 = scalar_select %p7104_p12, 1, 0 }
  0x35   : > { %p5997_p13 = pneg %p7104_p12  ;;  %s181_s9 = sshll.u32 %s173_s8, 4  ;;  %s7122_s9 = int_to_ptr.vmem [resolvable:$true] %s181_s9 }
  0x36   : > { %s6835_s22 = scalar_lea.hbm %s7946_s0, 1472 }
  0x37   : > { %p7113_p0 = pnand %p5997_p13, %p7950_p10  ;;  %p6836_p3 = scmp.ne.s32.totalorder %s7946_s0, %s6835_s22 }
  0x38   : > { %p6842_p11 = scmp.lt.u32.totalorder %s6835_s22, %s7946_s0 }
  0x39   : > { %p6837_p1 = pneg %p7113_p0 }
  0x3b   : > { %p6838_p2 = pnand %p6837_p1, %p6836_p3 }
  0x3d   : > { %p6839_p5 = pneg %p6838_p2 }
  0x3f   : > { %p6844_p13 = pnand %p6842_p11, %p6839_p5 }
  0x41   : > { %6847 = shalt.err (!%p6844_p13)
}
  0x42   : > { %s6848_s7 = scalar_lea.vmem %s138_s6, 1472  ;;  %p6856_p7 = scmp.lt.s32.totalorder %s138_s6, %s138_s6 }
  0x43   : > { %p6849_p10 = scmp.ne.s32.totalorder %s138_s6, %s6848_s7  ;;  %p6857_p4 = scmp.lt.s32.totalorder %s6848_s7, %s6848_s7 }
  0x45   : > { %p6851_p8 = pnand %p6849_p10, %p6837_p1  ;;  %p6858_p12 = por %p6857_p4, %p6856_p7 }
  0x47   : > { %p6852_p9 = pneg %p6851_p8 }
  0x49   : > { %p6859_p6 = pnand %p6858_p12, %p6852_p9 }
  0x4b   : > { %6862 = shalt.err (!%p6859_p6)
}
  0x4c   : > { %6000 = dma.hbm_to_vmem [thread:$0]  (!%p7113_p0), %s7946_s0, 1472, %s138_s6, [#allocation3]  }
  0x4d   : > { %s6863_s18 = scalar_lea.hbm %s7120_s17, 48  ;;  %p7963_p10 = scmp.ne.s32.totalorder %s7957_s23, 0 }
  0x4e   : > { %p6864_p3 = scmp.ne.s32.totalorder %s7120_s17, %s6863_s18  ;;  %s6868_s25 = scalar_lea.hbm %s7948_s2, 96 }
  0x4f   : > { %p7964_p8 = pneg %p7963_p10  ;;  %p6869_p6 = scmp.lt.u32.totalorder %s7120_s17, %s7948_s2 }
  0x50   : > { %p6870_p4 = scmp.lt.u32.totalorder %s6868_s25, %s6863_s18  ;;  %p6872_p9 = scmp.lt.u32.totalorder %s6863_s18, %s7120_s17 }
  0x51   : > { %p6866_p1 = pnand %p6864_p3, %p7964_p8 }
  0x52   : > { %p6871_p7 = por %p6870_p4, %p6869_p6 }
  0x53   : > { %p6867_p2 = pneg %p6866_p1 }
  0x54   : > { %p6873_p12 = por %p6872_p9, %p6871_p7 }
  0x56   : > { %p6874_p5 = pnand %p6873_p12, %p6867_p2 }
  0x58   : > { %6877 = shalt.err (!%p6874_p5)
}
  0x59   : > { %s6878_s6 = scalar_lea.vmem %s7122_s9, 48  ;;  %p7965_p11 = pmov %p7964_p8 }
  0x5a   : > { %p6879_p0 = scmp.ne.s32.totalorder %s7122_s9, %s6878_s6  ;;  %s6969_s5 = smov [#allocation7]  }
  0x5b   : > { %s6883_s8 = sshll.u32 %s6969_s5, 4  ;;  %s6884_s8 = int_to_ptr.vmem [resolvable:$false] %s6883_s8 }
  0x5c   : > { %p6881_p13 = pnand %p6879_p0, %p7965_p11  ;;  %s6885_s7 = scalar_lea.vmem %s6884_s8, 96 }
  0x5d   : > { %p6886_p8 = scmp.lt.s32.totalorder %s7122_s9, %s6884_s8  ;;  %p6887_p1 = scmp.lt.s32.totalorder %s6885_s7, %s6878_s6 }
  0x5e   : > { %p6882_p3 = pneg %p6881_p13 }
  0x5f   : > { %p6888_p6 = por %p6887_p1, %p6886_p8 }
  0x61   : > { %p6889_p4 = pnand %p6888_p6, %p6882_p3 }
  0x63   : > { %6892 = shalt.err (!%p6889_p4)
}
  0x64   : > { %6007 = dma.hbm_to_vmem [thread:$0]  (!%p7963_p10), %s7120_s17, 48, %s7122_s9, %s7047_s30  }
  0x65   : > { %p7966_p2 = scmp.ne.s32.totalorder %s7961_s4, 0 }
  0x66   : > { %p7967_p7 = scmp.eq.s32.totalorder (!%p7966_p2), %s7076_s24, 0 }
  0x67   : > { %190 = sbr.rel (%p7966_p2) target bundleno = 908 (0x38c), region = 32 }
  0x6e   : > { %6938 = dma.done.wait (%p7967_p7), [#allocation3], 1472   ;;  %p7968_p9 = pmov %p7967_p7 }
  0x6f   : > { %s196_s11 = sand.u32 1, %s7076_s24   ;;  %s7172_s21 = sand.u32 1, %s6955_s13  }
  0x70   : > { %6940 = vsyncadd (%p7968_p9), [#allocation3], 4294965824  ;;  %s5984_s23 = smul.u32 4368, %s7172_s21  ;;  %s197_s18 = scalar_lea.sflag [#allocation6], %s196_s11 }
  0x71   : > { %p7969_p10 = scmp.ne.s32.totalorder %s7958_s26, 0 }
  0x72   : > { %s7175_s20 = scalar_lea.vmem [#allocation5], %s5984_s23 }
  0x73   : > { %6942 = dma.done.wait (%p7969_p10), %s197_s18, 69936  }
  0x74   : > { %6944 = vsyncadd (%p7969_p10), %s197_s18, 4294897360  ;;  %v6054_v0 = vld [vmem:[%s7175_s20 + $0x4] ss:$12 sps:$4 sm:$0xff]   ;;  %v6058_v2 = vld [vmem:[%s7175_s20] ss:$12 sps:$4 sm:$0xff]   ;;  %s5985_s30 = smul.u32 3, %s7172_s21 }
  0x75   : > { %v6056_v1 = vld [vmem:[%s7175_s20 + $0x484] ss:$12 sps:$4 sm:$0xff]   ;;  %3993 = vmatprep.subr.bf16.mxu1 %v6054_v0  ;;  %v6059_v3 = vld [vmem:[%s7175_s20 + $0x480] ss:$12 sps:$4 sm:$0xff]   ;;  %v6060_v4 = vld [vmem:[%s7175_s20 + $0x1c] ss:$12 sps:$4 sm:$0xff]  }
  0x76   : > { %4116 = vmatprep.subr.bf16.mxu0 %v6056_v1  ;;  %3994 = vmatpush1.bf16.msra.mxu1 %v6058_v2  ;;  %v6062_v5 = vld [vmem:[%s7175_s20 + $0x49c] ss:$12 sps:$4 sm:$0xff]   ;;  %v6064_v6 = vld [vmem:[%s7175_s20 + $0x18] ss:$12 sps:$4 sm:$0xff]   ;;  %v6066_v8 = vld [vmem:[%s7175_s20 + $0x34] ss:$12 sps:$4 sm:$0xff]  }
  0x77   : > { %4117 = vmatpush1.bf16.msra.mxu0 %v6059_v3  ;;  %3995 = vmatprep.subr.bf16.mxu1 %v6060_v4  ;;  %v6065_v7 = vld [vmem:[%s7175_s20 + $0x498] ss:$12 sps:$4 sm:$0xff]   ;;  %v6068_v9 = vld [vmem:[%s7175_s20 + $0x4b4] ss:$12 sps:$4 sm:$0xff]   ;;  %v6070_v10 = vld [vmem:[%s7175_s20 + $0x30] ss:$12 sps:$4 sm:$0xff]  }
  0x78   : > { %4118 = vmatprep.subr.bf16.mxu0 %v6062_v5  ;;  %v6071_v11 = vld [vmem:[%s7175_s20 + $0x4b0] ss:$12 sps:$4 sm:$0xff]   ;;  %v6072_v12 = vld [vmem:[%s7175_s20 + $0x4c] ss:$12 sps:$4 sm:$0xff]   ;;  %v6076_v14 = vld [vmem:[%s7175_s20 + $0x48] ss:$12 sps:$4 sm:$0xff]  }
  0x79   : > { %v6074_v13 = vld [vmem:[%s7175_s20 + $0x4cc] ss:$12 sps:$4 sm:$0xff]   ;;  %v6077_v15 = vld [vmem:[%s7175_s20 + $0x4c8] ss:$12 sps:$4 sm:$0xff]   ;;  %v6078_v16 = vld [vmem:[%s7175_s20 + $0x64] ss:$12 sps:$4 sm:$0xff]  }
  0x7a   : > { %3996 = vmatpush1.bf16.msra.mxu1 %v6064_v6  ;;  %v6080_v17 = vld [vmem:[%s7175_s20 + $0x4e4] ss:$12 sps:$4 sm:$0xff]   ;;  %v6082_v18 = vld [vmem:[%s7175_s20 + $0x60] ss:$12 sps:$4 sm:$0xff]   ;;  %v6084_v20 = vld [vmem:[%s7175_s20 + $0x7c] ss:$12 sps:$4 sm:$0xff]  }
  0x7b   : > { %4119 = vmatpush1.bf16.msra.mxu0 %v6065_v7  ;;  %3997 = vmatprep.subr.bf16.mxu1 %v6066_v8  ;;  %v6083_v19 = vld [vmem:[%s7175_s20 + $0x4e0] ss:$12 sps:$4 sm:$0xff]   ;;  %v6086_v21 = vld [vmem:[%s7175_s20 + $0x4fc] ss:$12 sps:$4 sm:$0xff]   ;;  %v6088_v22 = vld [vmem:[%s7175_s20 + $0x78] ss:$12 sps:$4 sm:$0xff]  }
  0x7c   : > { %4120 = vmatprep.subr.bf16.mxu0 %v6068_v9  ;;  %v6089_v23 = vld [vmem:[%s7175_s20 + $0x4f8] ss:$12 sps:$4 sm:$0xff]   ;;  %v6090_v24 = vld [vmem:[%s7175_s20 + $0x94] ss:$12 sps:$4 sm:$0xff]   ;;  %v6094_v26 = vld [vmem:[%s7175_s20 + $0x90] ss:$12 sps:$4 sm:$0xff]  }
  0x7d   : > { %v6092_v25 = vld [vmem:[%s7175_s20 + $0x514] ss:$12 sps:$4 sm:$0xff]   ;;  %v6095_v27 = vld [vmem:[%s7175_s20 + $0x510] ss:$12 sps:$4 sm:$0xff]   ;;  %v6096_v28 = vld [vmem:[%s7175_s20 + $0xac] ss:$12 sps:$4 sm:$0xff]  }
  0x7e   : > { %3998 = vmatpush1.bf16.msra.mxu1 %v6070_v10  ;;  %v6098_v29 = vld [vmem:[%s7175_s20 + $0x52c] ss:$12 sps:$4 sm:$0xff]   ;;  %v6100_v30 = vld [vmem:[%s7175_s20 + $0xa8] ss:$12 sps:$4 sm:$0xff]   ;;  %v6102_v32 = vld [vmem:[%s7175_s20 + $0xc4] ss:$12 sps:$4 sm:$0xff]  }
  0x7f   : > { %4121 = vmatpush1.bf16.msra.mxu0 %v6071_v11  ;;  %3999 = vmatprep.subr.bf16.mxu1 %v6072_v12  ;;  %v6101_v31 = vld [vmem:[%s7175_s20 + $0x528] ss:$12 sps:$4 sm:$0xff]   ;;  %v6104_v33 = vld [vmem:[%s7175_s20 + $0x544] ss:$12 sps:$4 sm:$0xff]   ;;  %v6106_v34 = vld [vmem:[%s7175_s20 + $0xc0] ss:$12 sps:$4 sm:$0xff]  }
  0x80   : > { %4122 = vmatprep.subr.bf16.mxu0 %v6074_v13  ;;  %v6107_v35 = vld [vmem:[%s7175_s20 + $0x540] ss:$12 sps:$4 sm:$0xff]   ;;  %v6108_v36 = vld [vmem:[%s7175_s20 + $0xdc] ss:$12 sps:$4 sm:$0xff]   ;;  %v6112_v38 = vld [vmem:[%s7175_s20 + $0xd8] ss:$12 sps:$4 sm:$0xff]  }
  0x81   : > { %v6110_v37 = vld [vmem:[%s7175_s20 + $0x55c] ss:$12 sps:$4 sm:$0xff]   ;;  %v6113_v39 = vld [vmem:[%s7175_s20 + $0x558] ss:$12 sps:$4 sm:$0xff]   ;;  %v6114_v40 = vld [vmem:[%s7175_s20 + $0xf4] ss:$12 sps:$4 sm:$0xff]  }
  0x82   : > { %4000 = vmatpush1.bf16.msra.mxu1 %v6076_v14  ;;  %v6116_v41 = vld [vmem:[%s7175_s20 + $0x574] ss:$12 sps:$4 sm:$0xff]   ;;  %v6118_v42 = vld [vmem:[%s7175_s20 + $0xf0] ss:$12 sps:$4 sm:$0xff]   ;;  %v6120_v44 = vld [vmem:[%s7175_s20 + $0x10c] ss:$12 sps:$4 sm:$0xff]  }
  0x83   : > { %4123 = vmatpush1.bf16.msra.mxu0 %v6077_v15  ;;  %4001 = vmatprep.subr.bf16.mxu1 %v6078_v16  ;;  %v6119_v43 = vld [vmem:[%s7175_s20 + $0x570] ss:$12 sps:$4 sm:$0xff]   ;;  %v6122_v45 = vld [vmem:[%s7175_s20 + $0x58c] ss:$12 sps:$4 sm:$0xff]   ;;  %v6124_v47 = vld [vmem:[%s7175_s20 + $0x108] ss:$12 sps:$4 sm:$0xff]  }
  0x84   : > { %4124 = vmatprep.subr.bf16.mxu0 %v6080_v17  ;;  %v240_v46 = vld [vmem:[#allocation2] sm:$0xff]  ;;  %v243_v50 = vld [vmem:[#allocation2 + $0x18] sm:$0xff]  ;;  %s209_s26 = scalar_lea.vmem [#allocation7], %s5985_s30  ;;  %vm3989_vm0 = vcmask 785408   ;;  %vm6972_vm1 = vmmov 0   ;;  %s5986_s4 = smul.u32 24, %s7172_s21 }
  0x85   : > { %v7228_v48 = vcombine.high %v240_v46, %v240_v46  ;;  %v6125_v49 = vld [vmem:[%s7175_s20 + $0x588] ss:$12 sps:$4 sm:$0xff]   ;;  %v6126_v51 = vld [vmem:[%s7175_s20 + $0x124] ss:$12 sps:$4 sm:$0xff]   ;;  %v7233_v53 = vcombine.high %v243_v50, %v243_v50  ;;  %v6130_v54 = vld [vmem:[%s7175_s20 + $0x120] ss:$12 sps:$4 sm:$0xff]   ;;  %v7253_v6 = vcombine.low %v240_v46, %v240_v46  ;;  %v7255_v7 = vcombine.low %v243_v50, %v243_v50 }
  0x86   : > { %4002 = vmatpush1.bf16.msra.mxu1 %v6082_v18  ;;  %v6128_v52 = vld [vmem:[%s7175_s20 + $0x5a4] ss:$12 sps:$4 sm:$0xff]   ;;  %v6131_v55 = vld [vmem:[%s7175_s20 + $0x5a0] ss:$12 sps:$4 sm:$0xff]   ;;  %v6132_v56 = vld [vmem:[%s7175_s20 + $0x13c] ss:$12 sps:$4 sm:$0xff]  }
  0x87   : > { %4125 = vmatpush1.bf16.msra.mxu0 %v6083_v19  ;;  %4003 = vmatprep.subr.bf16.mxu1 %v6084_v20  ;;  %v6134_v57 = vld [vmem:[%s7175_s20 + $0x5bc] ss:$12 sps:$4 sm:$0xff]   ;;  %v6136_v58 = vld [vmem:[%s7175_s20 + $0x138] ss:$12 sps:$4 sm:$0xff]   ;;  %v6138_v60 = vld [vmem:[%s7175_s20 + $0x154] ss:$12 sps:$4 sm:$0xff]  }
  0x88   : > { %4126 = vmatprep.subr.bf16.mxu0 %v6086_v21  ;;  %4025 = vmatprep.mubr.bf16.mxu1 %v7228_v48  ;;  %v6137_v59 = vld [vmem:[%s7175_s20 + $0x5b8] ss:$12 sps:$4 sm:$0xff]   ;;  %v6140_v61 = vld [vmem:[%s7175_s20 + $0x5d4] ss:$12 sps:$4 sm:$0xff]   ;;  %v6142_v62 = vld [vmem:[%s7175_s20 + $0x150] ss:$12 sps:$4 sm:$0xff]  }
  0x89   : > { %4148 = vmatprep.mubr.bf16.mxu0 %v7233_v53  ;;  %v6143_v63 = vld [vmem:[%s7175_s20 + $0x5d0] ss:$12 sps:$4 sm:$0xff]   ;;  %v6144_v0 = vld [vmem:[%s7175_s20 + $0x16c] ss:$12 sps:$4 sm:$0xff]   ;;  %v6148_v2 = vld [vmem:[%s7175_s20 + $0x168] ss:$12 sps:$4 sm:$0xff]  }
  0x8a   : > { %4004 = vmatpush1.bf16.msra.mxu1 %v6088_v22  ;;  %v6146_v1 = vld [vmem:[%s7175_s20 + $0x5ec] ss:$12 sps:$4 sm:$0xff]   ;;  %v6149_v3 = vld [vmem:[%s7175_s20 + $0x5e8] ss:$12 sps:$4 sm:$0xff]   ;;  %v6154_v4 = vld [vmem:[%s7175_s20 + $0x184] ss:$12 sps:$4 sm:$0xff]  }
  0x8b   : > { %4127 = vmatpush1.bf16.msra.mxu0 %v6089_v23  ;;  %4005 = vmatprep.subr.bf16.mxu1 %v6090_v24  ;;  %v6159_v5 = vld [vmem:[%s7175_s20 + $0x604] ss:$12 sps:$4 sm:$0xff]   ;;  %v6152_v8 = vld [vmem:[%s7175_s20 + $0x180] ss:$12 sps:$4 sm:$0xff]   ;;  %v6162_v10 = vld [vmem:[%s7175_s20 + $0x19c] ss:$12 sps:$4 sm:$0xff]  }
  0x8c   : > { %4128 = vmatprep.subr.bf16.mxu0 %v6092_v25  ;;  %v6157_v9 = vld [vmem:[%s7175_s20 + $0x600] ss:$12 sps:$4 sm:$0xff]   ;;  %v6165_v11 = vld [vmem:[%s7175_s20 + $0x61c] ss:$12 sps:$4 sm:$0xff]   ;;  %v6160_v12 = vld [vmem:[%s7175_s20 + $0x198] ss:$12 sps:$4 sm:$0xff]  }
  0x8d   : > { %v6163_v13 = vld [vmem:[%s7175_s20 + $0x618] ss:$12 sps:$4 sm:$0xff]   ;;  %v6168_v14 = vld [vmem:[%s7175_s20 + $0x1b4] ss:$12 sps:$4 sm:$0xff]   ;;  %v6166_v16 = vld [vmem:[%s7175_s20 + $0x1b0] ss:$12 sps:$4 sm:$0xff]  }
  0x8e   : > { %4006 = vmatpush1.bf16.msra.mxu1 %v6094_v26  ;;  %v6171_v15 = vld [vmem:[%s7175_s20 + $0x634] ss:$12 sps:$4 sm:$0xff]   ;;  %v6169_v17 = vld [vmem:[%s7175_s20 + $0x630] ss:$12 sps:$4 sm:$0xff]   ;;  %v6174_v18 = vld [vmem:[%s7175_s20 + $0x1cc] ss:$12 sps:$4 sm:$0xff]  }
  0x8f   : > { %4129 = vmatpush1.bf16.msra.mxu0 %v6095_v27  ;;  %4007 = vmatprep.subr.bf16.mxu1 %v6096_v28  ;;  %v6177_v19 = vld [vmem:[%s7175_s20 + $0x64c] ss:$12 sps:$4 sm:$0xff]   ;;  %v6172_v20 = vld [vmem:[%s7175_s20 + $0x1c8] ss:$12 sps:$4 sm:$0xff]   ;;  %v6180_v22 = vld [vmem:[%s7175_s20 + $0x1e4] ss:$12 sps:$4 sm:$0xff]  }
  0x90   : > { %4130 = vmatprep.subr.bf16.mxu0 %v6098_v29  ;;  %v6175_v21 = vld [vmem:[%s7175_s20 + $0x648] ss:$12 sps:$4 sm:$0xff]   ;;  %v6183_v23 = vld [vmem:[%s7175_s20 + $0x664] ss:$12 sps:$4 sm:$0xff]   ;;  %v6178_v24 = vld [vmem:[%s7175_s20 + $0x1e0] ss:$12 sps:$4 sm:$0xff]  }
  0x91   : > { %v6181_v25 = vld [vmem:[%s7175_s20 + $0x660] ss:$12 sps:$4 sm:$0xff]   ;;  %v6186_v26 = vld [vmem:[%s7175_s20 + $0x1fc] ss:$12 sps:$4 sm:$0xff]   ;;  %v6184_v28 = vld [vmem:[%s7175_s20 + $0x1f8] ss:$12 sps:$4 sm:$0xff]  }
  0x92   : > { %4008 = vmatpush1.bf16.msra.mxu1 %v6100_v30  ;;  %v6189_v27 = vld [vmem:[%s7175_s20 + $0x67c] ss:$12 sps:$4 sm:$0xff]   ;;  %v6187_v29 = vld [vmem:[%s7175_s20 + $0x678] ss:$12 sps:$4 sm:$0xff]   ;;  %v6192_v30 = vld [vmem:[%s7175_s20 + $0x214] ss:$12 sps:$4 sm:$0xff]  }
  0x93   : > { %4131 = vmatpush1.bf16.msra.mxu0 %v6101_v31  ;;  %4009 = vmatprep.subr.bf16.mxu1 %v6102_v32  ;;  %v6195_v31 = vld [vmem:[%s7175_s20 + $0x694] ss:$12 sps:$4 sm:$0xff]   ;;  %v6210_v46 = vld [vmem:[%s7175_s20 + $0x25c] ss:$12 sps:$4 sm:$0xff]   ;;  %v6211_v50 = vld [vmem:[%s7175_s20 + $0x6d8] ss:$12 sps:$4 sm:$0xff]  }
  0x94   : > { %4132 = vmatprep.subr.bf16.mxu0 %v6104_v33  ;;  %v7283_v32 = vld [vmem:[#allocation2 + $0x8] sm:$0xff]  ;;  %s236_s9 = scalar_lea.vmem [#allocation8], %s5986_s4  ;;  %s5671_s17 = smul.u32 384, %s7076_s24 }
  0x95   : > { %v6190_v33 = vld [vmem:[%s7175_s20 + $0x210] ss:$12 sps:$4 sm:$0xff]   ;;  %s4986_s22 = sshll.u32 %s236_s9, 4  ;;  %s4972_s6 = scalar_lea.sflag [#allocation4], %s7172_s21  ;;  %s7904_s22 = int_to_ptr.vmem [resolvable:$true] %s4986_s22 }
  0x96   : > { %4010 = vmatpush1.bf16.msra.mxu1 %v6106_v34  ;;  %v6193_v34 = vld [vmem:[%s7175_s20 + $0x690] ss:$12 sps:$4 sm:$0xff]   ;;  %s7902_s29 = scalar_lea.hbm %s7949_s3, %s5671_s17  ;;  %s6893_s24 = scalar_lea.vmem %s7904_s22, 384 }
  0x97   : > { %4133 = vmatpush1.bf16.msra.mxu0 %v6107_v35  ;;  %4011 = vmatprep.subr.bf16.mxu1 %v6108_v36  ;;  %v7289_v35 = vcombine.high %v7283_v32, %v7283_v32  ;;  %v7291_v36 = vld [vmem:[#allocation2 + $0x20] sm:$0xff]  ;;  %p6894_p12 = scmp.ne.s32.totalorder %s7904_s22, %s6893_s24  ;;  %p7970_p5 = scmp.ne.s32.totalorder %s7959_s27, 0 }
  0x98   : > { %4134 = vmatprep.subr.bf16.mxu0 %v6110_v37  ;;  %v6198_v37 = vld [vmem:[%s7175_s20 + $0x22c] ss:$12 sps:$4 sm:$0xff]   ;;  %s6973_s5 = smov [#allocation8]  }
  0x99   : > { %p6895_p0 = pnand %p6894_p12, %p7970_p5  ;;  %s6897_s8 = sshll.u32 %s6973_s5, 4  ;;  %s6898_s8 = int_to_ptr.vmem [resolvable:$false] %s6897_s8 }
  0x9a   : > { %4012 = vmatpush1.bf16.msra.mxu1 %v6112_v38  ;;  %v7296_v38 = vcombine.high %v7291_v36, %v7291_v36  ;;  %s6899_s7 = scalar_lea.vmem %s6898_s8, 768  ;;  %p6900_p13 = scmp.lt.s32.totalorder %s7904_s22, %s6898_s8 }
  0x9b   : > { %4135 = vmatpush1.bf16.msra.mxu0 %v6113_v39  ;;  %4013 = vmatprep.subr.bf16.mxu1 %v6114_v40  ;;  %v6201_v39 = vld [vmem:[%s7175_s20 + $0x6ac] ss:$12 sps:$4 sm:$0xff]   ;;  %v6196_v40 = vld [vmem:[%s7175_s20 + $0x228] ss:$12 sps:$4 sm:$0xff]   ;;  %p6896_p11 = pneg %p6895_p0  ;;  %p6901_p3 = scmp.lt.s32.totalorder %s6899_s7, %s6893_s24 }
  0x9c   : > { %4136 = vmatprep.subr.bf16.mxu0 %v6116_v41  ;;  %v6199_v41 = vld [vmem:[%s7175_s20 + $0x6a8] ss:$12 sps:$4 sm:$0xff]  }
  0x9d   : > { %p6902_p8 = por %p6901_p3, %p6900_p13 }
  0x9e   : > { %4014 = vmatpush1.bf16.msra.mxu1 %v6118_v42  ;;  %v6204_v42 = vld [vmem:[%s7175_s20 + $0x244] ss:$12 sps:$4 sm:$0xff]  }
  0x9f   : > { %4137 = vmatpush1.bf16.msra.mxu0 %v6119_v43  ;;  %4015 = vmatprep.subr.bf16.mxu1 %v6120_v44  ;;  %v6207_v43 = vld [vmem:[%s7175_s20 + $0x6c4] ss:$12 sps:$4 sm:$0xff]   ;;  %v6202_v44 = vld [vmem:[%s7175_s20 + $0x240] ss:$12 sps:$4 sm:$0xff]   ;;  %p6903_p1 = pnand %p6902_p8, %p6896_p11 }
  0xa0   : > { %4138 = vmatprep.subr.bf16.mxu0 %v6122_v45  ;;  %v6205_v45 = vld [vmem:[%s7175_s20 + $0x6c0] ss:$12 sps:$4 sm:$0xff]  }
  0xa2   : > { %4016 = vmatpush1.bf16.msra.mxu1 %v6124_v47  ;;  %v6213_v47 = vld [vmem:[%s7175_s20 + $0x6dc] ss:$12 sps:$4 sm:$0xff]  }
  0xa3   : > { %4139 = vmatpush1.bf16.msra.mxu0 %v6125_v49  ;;  %4017 = vmatprep.subr.bf16.mxu1 %v6126_v51  ;;  %v6208_v49 = vld [vmem:[%s7175_s20 + $0x258] ss:$12 sps:$4 sm:$0xff]   ;;  %v6216_v51 = vld [vmem:[%s7175_s20 + $0x274] ss:$12 sps:$4 sm:$0xff]  }
  0xa4   : > { %4140 = vmatprep.subr.bf16.mxu0 %v6128_v52  ;;  %v6219_v52 = vld [vmem:[%s7175_s20 + $0x6f4] ss:$12 sps:$4 sm:$0xff]  }
  0xa6   : > { %4018 = vmatpush1.bf16.msra.mxu1 %v6130_v54  ;;  %v6214_v54 = vld [vmem:[%s7175_s20 + $0x270] ss:$12 sps:$4 sm:$0xff]  }
  0xa7   : > { %4141 = vmatpush1.bf16.msra.mxu0 %v6131_v55  ;;  %4019 = vmatprep.subr.bf16.mxu1 %v6132_v56  ;;  %v6217_v55 = vld [vmem:[%s7175_s20 + $0x6f0] ss:$12 sps:$4 sm:$0xff]   ;;  %v6222_v56 = vld [vmem:[%s7175_s20 + $0x28c] ss:$12 sps:$4 sm:$0xff]  }
  0xa8   : > { %4142 = vmatprep.subr.bf16.mxu0 %v6134_v57  ;;  %v6225_v57 = vld [vmem:[%s7175_s20 + $0x70c] ss:$12 sps:$4 sm:$0xff]  }
  0xaa   : > { %4020 = vmatpush1.bf16.msra.mxu1 %v6136_v58  ;;  %v6220_v58 = vld [vmem:[%s7175_s20 + $0x288] ss:$12 sps:$4 sm:$0xff]  }
  0xab   : > { %4143 = vmatpush1.bf16.msra.mxu0 %v6137_v59  ;;  %4021 = vmatprep.subr.bf16.mxu1 %v6138_v60  ;;  %v6223_v59 = vld [vmem:[%s7175_s20 + $0x708] ss:$12 sps:$4 sm:$0xff]   ;;  %v6228_v60 = vld [vmem:[%s7175_s20 + $0x2a4] ss:$12 sps:$4 sm:$0xff]  }
  0xac   : > { %4144 = vmatprep.subr.bf16.mxu0 %v6140_v61  ;;  %v6231_v61 = vld [vmem:[%s7175_s20 + $0x724] ss:$12 sps:$4 sm:$0xff]  }
  0xae   : > { %4022 = vmatpush1.bf16.msra.mxu1 %v6142_v62  ;;  %v6226_v62 = vld [vmem:[%s7175_s20 + $0x2a0] ss:$12 sps:$4 sm:$0xff]  }
  0xaf   : > { %4145 = vmatpush1.bf16.msra.mxu0 %v6143_v63  ;;  %4023 = vmatprep.subr.bf16.mxu1 %v6144_v0  ;;  %v6229_v63 = vld [vmem:[%s7175_s20 + $0x720] ss:$12 sps:$4 sm:$0xff]   ;;  %v6234_v0 = vld [vmem:[%s7175_s20 + $0x2bc] ss:$12 sps:$4 sm:$0xff]  }
  0xb0   : > { %4146 = vmatprep.subr.bf16.mxu0 %v6146_v1  ;;  %v6237_v1 = vld [vmem:[%s7175_s20 + $0x73c] ss:$12 sps:$4 sm:$0xff]  }
  0xb2   : > { %4024 = vmatpush1.bf16.msra.mxu1 %v6148_v2  ;;  %v6232_v2 = vld [vmem:[%s7175_s20 + $0x2b8] ss:$12 sps:$4 sm:$0xff]  }
  0xb3   : > { %4147 = vmatpush1.bf16.msra.mxu0 %v6149_v3  ;;  %4034 = vmatprep.subr.bf16.mxu1 %v6154_v4  ;;  %v6235_v3 = vld [vmem:[%s7175_s20 + $0x738] ss:$12 sps:$4 sm:$0xff]   ;;  %v6240_v4 = vld [vmem:[%s7175_s20 + $0x2d4] ss:$12 sps:$4 sm:$0xff]  }
  0xb4   : > { %4157 = vmatprep.subr.bf16.mxu0 %v6159_v5  ;;  %v6243_v5 = vld [vmem:[%s7175_s20 + $0x754] ss:$12 sps:$4 sm:$0xff]  }
  0xb5   : > { %4026 = vmatmul.mubr.bf16.vlgmr.msra.gmra.mrb[0].mxu1 %v7253_v6 }
  0xb6   : > { %4149 = vmatmul.mubr.bf16.vlgmr.msra.gmra.mrb[0].mxu0 %v7255_v7  ;;  %4035 = vmatpush1.bf16.msra.mxu1 %v6152_v8  ;;  %v6238_v8 = vld [vmem:[%s7175_s20 + $0x2d0] ss:$12 sps:$4 sm:$0xff]  }
  0xb7   : > { %4158 = vmatpush1.bf16.msra.mxu0 %v6157_v9  ;;  %4036 = vmatprep.subr.bf16.mxu1 %v6162_v10  ;;  %v6241_v9 = vld [vmem:[%s7175_s20 + $0x750] ss:$12 sps:$4 sm:$0xff]   ;;  %v6246_v10 = vld [vmem:[%s7175_s20 + $0x2ec] ss:$12 sps:$4 sm:$0xff]  }
  0xb8   : > { %4159 = vmatprep.subr.bf16.mxu0 %v6165_v11  ;;  %4066 = vmatprep.mubr.bf16.mxu1 %v7289_v35  ;;  %v6249_v11 = vld [vmem:[%s7175_s20 + $0x76c] ss:$12 sps:$4 sm:$0xff]  }
  0xb9   : > { %4189 = vmatprep.mubr.bf16.mxu0 %v7296_v38 }
  0xba   : > { %4037 = vmatpush1.bf16.msra.mxu1 %v6160_v12  ;;  %v6244_v12 = vld [vmem:[%s7175_s20 + $0x2e8] ss:$12 sps:$4 sm:$0xff]  }
  0xbb   : > { %4160 = vmatpush1.bf16.msra.mxu0 %v6163_v13  ;;  %4038 = vmatprep.subr.bf16.mxu1 %v6168_v14  ;;  %v6247_v13 = vld [vmem:[%s7175_s20 + $0x768] ss:$12 sps:$4 sm:$0xff]   ;;  %v6254_v14 = vld [vmem:[%s7175_s20 + $0x304] ss:$12 sps:$4 sm:$0xff]  }
  0xbc   : > { %4161 = vmatprep.subr.bf16.mxu0 %v6171_v15  ;;  %v6259_v15 = vld [vmem:[%s7175_s20 + $0x784] ss:$12 sps:$4 sm:$0xff]  }
  0xbe   : > { %4039 = vmatpush1.bf16.msra.mxu1 %v6166_v16  ;;  %v7339_v16 = vcombine.low %v7283_v32, %v7283_v32  ;;  %v6274_v32 = vld [vmem:[%s7175_s20 + $0x34c] ss:$12 sps:$4 sm:$0xff]  }
  0xbf   : > { %4162 = vmatpush1.bf16.msra.mxu0 %v6169_v17  ;;  %4040 = vmatprep.subr.bf16.mxu1 %v6174_v18  ;;  %v6252_v17 = vld [vmem:[%s7175_s20 + $0x300] ss:$12 sps:$4 sm:$0xff]   ;;  %v7344_v18 = vcombine.low %v7291_v36, %v7291_v36  ;;  %v6275_v36 = vld [vmem:[%s7175_s20 + $0x7c8] ss:$12 sps:$4 sm:$0xff]  }
  0xc0   : > { %4163 = vmatprep.subr.bf16.mxu0 %v6177_v19  ;;  %v6257_v19 = vld [vmem:[%s7175_s20 + $0x780] ss:$12 sps:$4 sm:$0xff]  }
  0xc2   : > { %4041 = vmatpush1.bf16.msra.mxu1 %v6172_v20  ;;  %v6262_v20 = vld [vmem:[%s7175_s20 + $0x31c] ss:$12 sps:$4 sm:$0xff]  }
  0xc3   : > { %4164 = vmatpush1.bf16.msra.mxu0 %v6175_v21  ;;  %4042 = vmatprep.subr.bf16.mxu1 %v6180_v22  ;;  %v6265_v21 = vld [vmem:[%s7175_s20 + $0x79c] ss:$12 sps:$4 sm:$0xff]  }
  0xc4   : > { %4165 = vmatprep.subr.bf16.mxu0 %v6183_v23  ;;  %v7349_v22 = vld [vmem:[#allocation2 + $0x10] sm:$0xff]  ;;  %v7351_v23 = vld [vmem:[#allocation2 + $0x28] sm:$0xff] }
  0xc6   : > { %4043 = vmatpush1.bf16.msra.mxu1 %v6178_v24  ;;  %v6260_v24 = vld [vmem:[%s7175_s20 + $0x318] ss:$12 sps:$4 sm:$0xff]  }
  0xc7   : > { %4166 = vmatpush1.bf16.msra.mxu0 %v6181_v25  ;;  %4044 = vmatprep.subr.bf16.mxu1 %v6186_v26  ;;  %v7356_v25 = vcombine.high %v7349_v22, %v7349_v22  ;;  %v7360_v26 = vcombine.high %v7351_v23, %v7351_v23 }
  0xc8   : > { %4167 = vmatprep.subr.bf16.mxu0 %v6189_v27  ;;  %v6263_v27 = vld [vmem:[%s7175_s20 + $0x798] ss:$12 sps:$4 sm:$0xff]  }
  0xca   : > { %4045 = vmatpush1.bf16.msra.mxu1 %v6184_v28  ;;  %v6268_v28 = vld [vmem:[%s7175_s20 + $0x334] ss:$12 sps:$4 sm:$0xff]  }
  0xcb   : > { %4168 = vmatpush1.bf16.msra.mxu0 %v6187_v29  ;;  %4046 = vmatprep.subr.bf16.mxu1 %v6192_v30  ;;  %v6271_v29 = vld [vmem:[%s7175_s20 + $0x7b4] ss:$12 sps:$4 sm:$0xff]   ;;  %v6266_v30 = vld [vmem:[%s7175_s20 + $0x330] ss:$12 sps:$4 sm:$0xff]  }
  0xcc   : > { %4169 = vmatprep.subr.bf16.mxu0 %v6195_v31  ;;  %v6269_v31 = vld [vmem:[%s7175_s20 + $0x7b0] ss:$12 sps:$4 sm:$0xff]  }
  0xce   : > { %4047 = vmatpush1.bf16.msra.mxu1 %v6190_v33  ;;  %v6277_v33 = vld [vmem:[%s7175_s20 + $0x7cc] ss:$12 sps:$4 sm:$0xff]  }
  0xcf   : > { %4170 = vmatpush1.bf16.msra.mxu0 %v6193_v34  ;;  %4048 = vmatprep.subr.bf16.mxu1 %v6198_v37  ;;  %v6272_v34 = vld [vmem:[%s7175_s20 + $0x348] ss:$12 sps:$4 sm:$0xff]   ;;  %v6280_v37 = vld [vmem:[%s7175_s20 + $0x364] ss:$12 sps:$4 sm:$0xff]  }
  0xd0   : > { %4171 = vmatprep.subr.bf16.mxu0 %v6201_v39  ;;  %v6283_v39 = vld [vmem:[%s7175_s20 + $0x7e4] ss:$12 sps:$4 sm:$0xff]  }
  0xd2   : > { %4049 = vmatpush1.bf16.msra.mxu1 %v6196_v40  ;;  %v6278_v40 = vld [vmem:[%s7175_s20 + $0x360] ss:$12 sps:$4 sm:$0xff]  }
  0xd3   : > { %4172 = vmatpush1.bf16.msra.mxu0 %v6199_v41  ;;  %4050 = vmatprep.subr.bf16.mxu1 %v6204_v42  ;;  %v6281_v41 = vld [vmem:[%s7175_s20 + $0x7e0] ss:$12 sps:$4 sm:$0xff]   ;;  %v6286_v42 = vld [vmem:[%s7175_s20 + $0x37c] ss:$12 sps:$4 sm:$0xff]  }
  0xd4   : > { %4173 = vmatprep.subr.bf16.mxu0 %v6207_v43  ;;  %v6289_v43 = vld [vmem:[%s7175_s20 + $0x7fc] ss:$12 sps:$4 sm:$0xff]  }
  0xd6   : > { %4051 = vmatpush1.bf16.msra.mxu1 %v6202_v44  ;;  %v6284_v44 = vld [vmem:[%s7175_s20 + $0x378] ss:$12 sps:$4 sm:$0xff]  }
  0xd7   : > { %4174 = vmatpush1.bf16.msra.mxu0 %v6205_v45  ;;  %4052 = vmatprep.subr.bf16.mxu1 %v6210_v46  ;;  %v6287_v45 = vld [vmem:[%s7175_s20 + $0x7f8] ss:$12 sps:$4 sm:$0xff]   ;;  %v6292_v46 = vld [vmem:[%s7175_s20 + $0x394] ss:$12 sps:$4 sm:$0xff]  }
  0xd8   : > { %4175 = vmatprep.subr.bf16.mxu0 %v6213_v47  ;;  %v6295_v47 = vld [vmem:[%s7175_s20 + $0x814] ss:$12 sps:$4 sm:$0xff]  }
  0xda   : > { %4053 = vmatpush1.bf16.msra.mxu1 %v6208_v49  ;;  %v6290_v49 = vld [vmem:[%s7175_s20 + $0x390] ss:$12 sps:$4 sm:$0xff]  }
  0xdb   : > { %4176 = vmatpush1.bf16.msra.mxu0 %v6211_v50  ;;  %4054 = vmatprep.subr.bf16.mxu1 %v6216_v51  ;;  %v6293_v50 = vld [vmem:[%s7175_s20 + $0x810] ss:$12 sps:$4 sm:$0xff]   ;;  %v6298_v51 = vld [vmem:[%s7175_s20 + $0x3ac] ss:$12 sps:$4 sm:$0xff]  }
  0xdc   : > { %4177 = vmatprep.subr.bf16.mxu0 %v6219_v52  ;;  %v6301_v52 = vld [vmem:[%s7175_s20 + $0x82c] ss:$12 sps:$4 sm:$0xff]  }
  0xde   : > { %4055 = vmatpush1.bf16.msra.mxu1 %v6214_v54  ;;  %v6296_v54 = vld [vmem:[%s7175_s20 + $0x3a8] ss:$12 sps:$4 sm:$0xff]  }
  0xdf   : > { %4178 = vmatpush1.bf16.msra.mxu0 %v6217_v55  ;;  %4056 = vmatprep.subr.bf16.mxu1 %v6222_v56  ;;  %v6299_v55 = vld [vmem:[%s7175_s20 + $0x828] ss:$12 sps:$4 sm:$0xff]   ;;  %v6304_v56 = vld [vmem:[%s7175_s20 + $0x3c4] ss:$12 sps:$4 sm:$0xff]  }
  0xe0   : > { %4179 = vmatprep.subr.bf16.mxu0 %v6225_v57  ;;  %v6307_v57 = vld [vmem:[%s7175_s20 + $0x844] ss:$12 sps:$4 sm:$0xff]  }
  0xe2   : > { %4057 = vmatpush1.bf16.msra.mxu1 %v6220_v58  ;;  %v6302_v58 = vld [vmem:[%s7175_s20 + $0x3c0] ss:$12 sps:$4 sm:$0xff]  }
  0xe3   : > { %4180 = vmatpush1.bf16.msra.mxu0 %v6223_v59  ;;  %4058 = vmatprep.subr.bf16.mxu1 %v6228_v60  ;;  %v6305_v59 = vld [vmem:[%s7175_s20 + $0x840] ss:$12 sps:$4 sm:$0xff]   ;;  %v6310_v60 = vld [vmem:[%s7175_s20 + $0x3dc] ss:$12 sps:$4 sm:$0xff]  }
  0xe4   : > { %4181 = vmatprep.subr.bf16.mxu0 %v6231_v61  ;;  %v6313_v61 = vld [vmem:[%s7175_s20 + $0x85c] ss:$12 sps:$4 sm:$0xff]  }
  0xe6   : > { %4059 = vmatpush1.bf16.msra.mxu1 %v6226_v62  ;;  %v6308_v62 = vld [vmem:[%s7175_s20 + $0x3d8] ss:$12 sps:$4 sm:$0xff]  }
  0xe7   : > { %4182 = vmatpush1.bf16.msra.mxu0 %v6229_v63  ;;  %4060 = vmatprep.subr.bf16.mxu1 %v6234_v0  ;;  %v6311_v63 = vld [vmem:[%s7175_s20 + $0x858] ss:$12 sps:$4 sm:$0xff]   ;;  %v6316_v0 = vld [vmem:[%s7175_s20 + $0x3f4] ss:$12 sps:$4 sm:$0xff]  }
  0xe8   : > { %4183 = vmatprep.subr.bf16.mxu0 %v6237_v1  ;;  %v6319_v1 = vld [vmem:[%s7175_s20 + $0x874] ss:$12 sps:$4 sm:$0xff]  }
  0xea   : > { %4061 = vmatpush1.bf16.msra.mxu1 %v6232_v2  ;;  %v6314_v2 = vld [vmem:[%s7175_s20 + $0x3f0] ss:$12 sps:$4 sm:$0xff]  }
  0xeb   : > { %4184 = vmatpush1.bf16.msra.mxu0 %v6235_v3  ;;  %4062 = vmatprep.subr.bf16.mxu1 %v6240_v4  ;;  %v6317_v3 = vld [vmem:[%s7175_s20 + $0x870] ss:$12 sps:$4 sm:$0xff]   ;;  %v6322_v4 = vld [vmem:[%s7175_s20 + $0x40c] ss:$12 sps:$4 sm:$0xff]  }
  0xec   : > { %4185 = vmatprep.subr.bf16.mxu0 %v6243_v5  ;;  %v6325_v5 = vld [vmem:[%s7175_s20 + $0x88c] ss:$12 sps:$4 sm:$0xff]  }
  0xee   : > { %4063 = vmatpush1.bf16.msra.mxu1 %v6238_v8  ;;  %v6320_v8 = vld [vmem:[%s7175_s20 + $0x408] ss:$12 sps:$4 sm:$0xff]  }
  0xef   : > { %4186 = vmatpush1.bf16.msra.mxu0 %v6241_v9  ;;  %4064 = vmatprep.subr.bf16.mxu1 %v6246_v10  ;;  %v6323_v9 = vld [vmem:[%s7175_s20 + $0x888] ss:$12 sps:$4 sm:$0xff]   ;;  %v6328_v10 = vld [vmem:[%s7175_s20 + $0x424] ss:$12 sps:$4 sm:$0xff]  }
  0xf0   : > { %4187 = vmatprep.subr.bf16.mxu0 %v6249_v11  ;;  %v6331_v11 = vld [vmem:[%s7175_s20 + $0x8a4] ss:$12 sps:$4 sm:$0xff]  }
  0xf2   : > { %4065 = vmatpush1.bf16.msra.mxu1 %v6244_v12  ;;  %v6326_v12 = vld [vmem:[%s7175_s20 + $0x420] ss:$12 sps:$4 sm:$0xff]  }
  0xf3   : > { %4188 = vmatpush1.bf16.msra.mxu0 %v6247_v13  ;;  %4075 = vmatprep.subr.bf16.mxu1 %v6254_v14  ;;  %v6329_v13 = vld [vmem:[%s7175_s20 + $0x8a0] ss:$12 sps:$4 sm:$0xff]   ;;  %v6334_v14 = vld [vmem:[%s7175_s20 + $0x43c] ss:$12 sps:$4 sm:$0xff]  }
  0xf4   : > { %4198 = vmatprep.subr.bf16.mxu0 %v6259_v15  ;;  %v6337_v15 = vld [vmem:[%s7175_s20 + $0x8bc] ss:$12 sps:$4 sm:$0xff]  }
  0xf5   : > { %4067 = vmatmul.mubr.bf16.vlgmr.msra.gmra.mrb[0].mxu1 %v7339_v16 }
  0xf6   : > { %4190 = vmatmul.mubr.bf16.vlgmr.msra.gmra.mrb[0].mxu0 %v7344_v18  ;;  %4076 = vmatpush1.bf16.msra.mxu1 %v6252_v17  ;;  %v6332_v17 = vld [vmem:[%s7175_s20 + $0x438] ss:$12 sps:$4 sm:$0xff]  }
  0xf7   : > { %4199 = vmatpush1.bf16.msra.mxu0 %v6257_v19  ;;  %4077 = vmatprep.subr.bf16.mxu1 %v6262_v20  ;;  %v6335_v19 = vld [vmem:[%s7175_s20 + $0x8b8] ss:$12 sps:$4 sm:$0xff]   ;;  %v6340_v20 = vld [vmem:[%s7175_s20 + $0x454] ss:$12 sps:$4 sm:$0xff]  }
  0xf8   : > { %4200 = vmatprep.subr.bf16.mxu0 %v6265_v21  ;;  %4107 = vmatprep.mubr.bf16.mxu1 %v7356_v25  ;;  %v6343_v21 = vld [vmem:[%s7175_s20 + $0x8d4] ss:$12 sps:$4 sm:$0xff]  }
  0xf9   : > { %4230 = vmatprep.mubr.bf16.mxu0 %v7360_v26 }
  0xfa   : > { %4078 = vmatpush1.bf16.msra.mxu1 %v6260_v24  ;;  %v6338_v24 = vld [vmem:[%s7175_s20 + $0x450] ss:$12 sps:$4 sm:$0xff]  }
  0xfb   : > { %4201 = vmatpush1.bf16.msra.mxu0 %v6263_v27  ;;  %4079 = vmatprep.subr.bf16.mxu1 %v6268_v28  ;;  %v6341_v27 = vld [vmem:[%s7175_s20 + $0x8d0] ss:$12 sps:$4 sm:$0xff]   ;;  %v6346_v28 = vld [vmem:[%s7175_s20 + $0x46c] ss:$12 sps:$4 sm:$0xff]  }
  0xfc   : > { %4202 = vmatprep.subr.bf16.mxu0 %v6271_v29  ;;  %v6349_v29 = vld [vmem:[%s7175_s20 + $0x8ec] ss:$12 sps:$4 sm:$0xff]  }
  0xfe   : > { %4080 = vmatpush1.bf16.msra.mxu1 %v6266_v30  ;;  %v6344_v30 = vld [vmem:[%s7175_s20 + $0x468] ss:$12 sps:$4 sm:$0xff]  }
  0xff   : > { %4203 = vmatpush1.bf16.msra.mxu0 %v6269_v31  ;;  %4081 = vmatprep.subr.bf16.mxu1 %v6274_v32  ;;  %v6347_v31 = vld [vmem:[%s7175_s20 + $0x8e8] ss:$12 sps:$4 sm:$0xff]   ;;  %v6356_v32 = vld [vmem:[%s7175_s20 + $0x904] ss:$12 sps:$4 sm:$0xff]  }
 0x100   : > { %4204 = vmatprep.subr.bf16.mxu0 %v6277_v33  ;;  %v6357_v33 = vld [vmem:[%s7175_s20 + $0xc8] ss:$12 sps:$4 sm:$0xff]  }
 0x102   : > { %4082 = vmatpush1.bf16.msra.mxu1 %v6272_v34  ;;  %v6354_v34 = vld [vmem:[%s7175_s20 + $0x900] ss:$12 sps:$4 sm:$0xff]  }
 0x103   : > { %4205 = vmatpush1.bf16.msra.mxu0 %v6275_v36  ;;  %4083 = vmatprep.subr.bf16.mxu1 %v6280_v37  ;;  %v7428_v36 = vcombine.low %v7349_v22, %v7349_v22  ;;  %v7432_v37 = vcombine.low %v7351_v23, %v7351_v23  ;;  %v6363_v23 = vld [vmem:[%s7175_s20 + $0x20] ss:$12 sps:$4 sm:$0xff]  }
 0x104   : > { %4206 = vmatprep.subr.bf16.mxu0 %v6283_v39  ;;  %v6358_v39 = vld [vmem:[%s7175_s20 + $0x8] ss:$12 sps:$4 sm:$0xff]  }
 0x106   : > { %4084 = vmatpush1.bf16.msra.mxu1 %v6278_v40  ;;  %v7435_v40 = vld [vmem:[#allocation2 + $0x30] sm:$0xff] }
 0x107   : > { %4207 = vmatpush1.bf16.msra.mxu0 %v6281_v41  ;;  %4085 = vmatprep.subr.bf16.mxu1 %v6286_v42  ;;  %v6361_v41 = vld [vmem:[%s7175_s20 + $0x91c] ss:$12 sps:$4 sm:$0xff]   ;;  %v6362_v42 = vld [vmem:[%s7175_s20 + $0xe0] ss:$12 sps:$4 sm:$0xff]   ;;  %v7442_v22 = vcombine.high %v7435_v40, %v7435_v40 }
 0x108   : > { %4208 = vmatprep.subr.bf16.mxu0 %v6289_v43  ;;  %v6359_v43 = vld [vmem:[%s7175_s20 + $0x918] ss:$12 sps:$4 sm:$0xff]  }
 0x10a   : > { %4086 = vmatpush1.bf16.msra.mxu1 %v6284_v44  ;;  %v6366_v44 = vld [vmem:[%s7175_s20 + $0x934] ss:$12 sps:$4 sm:$0xff]  }
 0x10b   : > { %4209 = vmatpush1.bf16.msra.mxu0 %v6287_v45  ;;  %4087 = vmatprep.subr.bf16.mxu1 %v6292_v46  ;;  %v6367_v45 = vld [vmem:[%s7175_s20 + $0xf8] ss:$12 sps:$4 sm:$0xff]   ;;  %v6364_v46 = vld [vmem:[%s7175_s20 + $0x930] ss:$12 sps:$4 sm:$0xff]  }
 0x10c   : > { %4210 = vmatprep.subr.bf16.mxu0 %v6295_v47  ;;  %v6368_v47 = vld [vmem:[%s7175_s20 + $0x38] ss:$12 sps:$4 sm:$0xff]  }
 0x10e   : > { %4088 = vmatpush1.bf16.msra.mxu1 %v6290_v49  ;;  %v6371_v49 = vld [vmem:[%s7175_s20 + $0x94c] ss:$12 sps:$4 sm:$0xff]  }
 0x10f   : > { %4211 = vmatpush1.bf16.msra.mxu0 %v6293_v50  ;;  %4089 = vmatprep.subr.bf16.mxu1 %v6298_v51  ;;  %v6372_v50 = vld [vmem:[%s7175_s20 + $0x110] ss:$12 sps:$4 sm:$0xff]   ;;  %v6369_v51 = vld [vmem:[%s7175_s20 + $0x948] ss:$12 sps:$4 sm:$0xff]  }
 0x110   : > { %4212 = vmatprep.subr.bf16.mxu0 %v6301_v52  ;;  %v6376_v52 = vld [vmem:[%s7175_s20 + $0x964] ss:$12 sps:$4 sm:$0xff]  }
 0x112   : > { %4090 = vmatpush1.bf16.msra.mxu1 %v6296_v54  ;;  %v6377_v54 = vld [vmem:[%s7175_s20 + $0x128] ss:$12 sps:$4 sm:$0xff]  }
 0x113   : > { %4213 = vmatpush1.bf16.msra.mxu0 %v6299_v55  ;;  %4091 = vmatprep.subr.bf16.mxu1 %v6304_v56  ;;  %v6374_v55 = vld [vmem:[%s7175_s20 + $0x960] ss:$12 sps:$4 sm:$0xff]   ;;  %v6378_v56 = vld [vmem:[%s7175_s20 + $0x68] ss:$12 sps:$4 sm:$0xff]  }
 0x114   : > { %4214 = vmatprep.subr.bf16.mxu0 %v6307_v57  ;;  %v6381_v57 = vld [vmem:[%s7175_s20 + $0x97c] ss:$12 sps:$4 sm:$0xff]  }
 0x116   : > { %4092 = vmatpush1.bf16.msra.mxu1 %v6302_v58  ;;  %v6382_v58 = vld [vmem:[%s7175_s20 + $0x140] ss:$12 sps:$4 sm:$0xff]  }
 0x117   : > { %4215 = vmatpush1.bf16.msra.mxu0 %v6305_v59  ;;  %4093 = vmatprep.subr.bf16.mxu1 %v6310_v60  ;;  %v6379_v59 = vld [vmem:[%s7175_s20 + $0x978] ss:$12 sps:$4 sm:$0xff]   ;;  %v6383_v60 = vld [vmem:[%s7175_s20 + $0x80] ss:$12 sps:$4 sm:$0xff]  }
 0x118   : > { %4216 = vmatprep.subr.bf16.mxu0 %v6313_v61  ;;  %v6386_v61 = vld [vmem:[%s7175_s20 + $0x994] ss:$12 sps:$4 sm:$0xff]  }
 0x11a   : > { %4094 = vmatpush1.bf16.msra.mxu1 %v6308_v62  ;;  %v6387_v62 = vld [vmem:[%s7175_s20 + $0x158] ss:$12 sps:$4 sm:$0xff]  }
 0x11b   : > { %4217 = vmatpush1.bf16.msra.mxu0 %v6311_v63  ;;  %4095 = vmatprep.subr.bf16.mxu1 %v6316_v0  ;;  %v6384_v63 = vld [vmem:[%s7175_s20 + $0x990] ss:$12 sps:$4 sm:$0xff]   ;;  %v6388_v0 = vld [vmem:[%s7175_s20 + $0x98] ss:$12 sps:$4 sm:$0xff]  }
 0x11c   : > { %4218 = vmatprep.subr.bf16.mxu0 %v6319_v1  ;;  %v6391_v1 = vld [vmem:[%s7175_s20 + $0x9ac] ss:$12 sps:$4 sm:$0xff]  }
 0x11e   : > { %4096 = vmatpush1.bf16.msra.mxu1 %v6314_v2  ;;  %v6392_v2 = vld [vmem:[%s7175_s20 + $0x170] ss:$12 sps:$4 sm:$0xff]  }
 0x11f   : > { %4219 = vmatpush1.bf16.msra.mxu0 %v6317_v3  ;;  %4097 = vmatprep.subr.bf16.mxu1 %v6322_v4  ;;  %v6389_v3 = vld [vmem:[%s7175_s20 + $0x9a8] ss:$12 sps:$4 sm:$0xff]   ;;  %v6393_v4 = vld [vmem:[%s7175_s20 + $0xb0] ss:$12 sps:$4 sm:$0xff]  }
 0x120   : > { %4220 = vmatprep.subr.bf16.mxu0 %v6325_v5  ;;  %v6396_v5 = vld [vmem:[%s7175_s20 + $0x9c4] ss:$12 sps:$4 sm:$0xff]  }
 0x122   : > { %4098 = vmatpush1.bf16.msra.mxu1 %v6320_v8  ;;  %v6397_v8 = vld [vmem:[%s7175_s20 + $0x248] ss:$12 sps:$4 sm:$0xff]  }
 0x123   : > { %4221 = vmatpush1.bf16.msra.mxu0 %v6323_v9  ;;  %4099 = vmatprep.subr.bf16.mxu1 %v6328_v10  ;;  %v6394_v9 = vld [vmem:[%s7175_s20 + $0x9c0] ss:$12 sps:$4 sm:$0xff]   ;;  %v6398_v10 = vld [vmem:[%s7175_s20 + $0x188] ss:$12 sps:$4 sm:$0xff]  }
 0x124   : > { %4222 = vmatprep.subr.bf16.mxu0 %v6331_v11  ;;  %v6401_v11 = vld [vmem:[%s7175_s20 + $0x9dc] ss:$12 sps:$4 sm:$0xff]  }
 0x126   : > { %4100 = vmatpush1.bf16.msra.mxu1 %v6326_v12  ;;  %v6402_v12 = vld [vmem:[%s7175_s20 + $0x260] ss:$12 sps:$4 sm:$0xff]  }
 0x127   : > { %4223 = vmatpush1.bf16.msra.mxu0 %v6329_v13  ;;  %4101 = vmatprep.subr.bf16.mxu1 %v6334_v14  ;;  %v6399_v13 = vld [vmem:[%s7175_s20 + $0x9d8] ss:$12 sps:$4 sm:$0xff]   ;;  %v6403_v14 = vld [vmem:[%s7175_s20 + $0x1a0] ss:$12 sps:$4 sm:$0xff]  }
 0x128   : > { %4224 = vmatprep.subr.bf16.mxu0 %v6337_v15  ;;  %v6406_v15 = vld [vmem:[%s7175_s20 + $0x9f4] ss:$12 sps:$4 sm:$0xff]  }
 0x12a   : > { %4102 = vmatpush1.bf16.msra.mxu1 %v6332_v17  ;;  %v6407_v17 = vld [vmem:[%s7175_s20 + $0x278] ss:$12 sps:$4 sm:$0xff]  }
 0x12b   : > { %4225 = vmatpush1.bf16.msra.mxu0 %v6335_v19  ;;  %4103 = vmatprep.subr.bf16.mxu1 %v6340_v20  ;;  %v6404_v19 = vld [vmem:[%s7175_s20 + $0x9f0] ss:$12 sps:$4 sm:$0xff]   ;;  %v6408_v20 = vld [vmem:[%s7175_s20 + $0x1b8] ss:$12 sps:$4 sm:$0xff]  }
 0x12c   : > { %4226 = vmatprep.subr.bf16.mxu0 %v6343_v21  ;;  %v6412_v21 = vld [vmem:[%s7175_s20 + $0x290] ss:$12 sps:$4 sm:$0xff]  }
 0x12e   : > { %4104 = vmatpush1.bf16.msra.mxu1 %v6338_v24  ;;  %v6409_v24 = vld [vmem:[%s7175_s20 + $0xa08] ss:$12 sps:$4 sm:$0xff]  }
 0x12f   : > { %4227 = vmatpush1.bf16.msra.mxu0 %v6341_v27  ;;  %4105 = vmatprep.subr.bf16.mxu1 %v6346_v28  ;;  %v6413_v27 = vld [vmem:[%s7175_s20 + $0x1d0] ss:$12 sps:$4 sm:$0xff]   ;;  %v6417_v28 = vld [vmem:[%s7175_s20 + $0x2a8] ss:$12 sps:$4 sm:$0xff]  }
 0x130   : > { %4228 = vmatprep.subr.bf16.mxu0 %v6349_v29  ;;  %v6414_v29 = vld [vmem:[%s7175_s20 + $0xa20] ss:$12 sps:$4 sm:$0xff]  }
 0x132   : > { %4106 = vmatpush1.bf16.msra.mxu1 %v6344_v30  ;;  %v6418_v30 = vld [vmem:[%s7175_s20 + $0x1e8] ss:$12 sps:$4 sm:$0xff]  }
 0x133   : > { %4229 = vmatpush1.bf16.msra.mxu0 %v6347_v31  ;;  %5672 = vmatprep.subr.bf16.mxu1 %v6357_v33  ;;  %v6421_v31 = vld [vmem:[%s7175_s20 + $0xa3c] ss:$12 sps:$4 sm:$0xff]   ;;  %v6419_v33 = vld [vmem:[%s7175_s20 + $0xa38] ss:$12 sps:$4 sm:$0xff]  }
 0x134   : > { %4239 = vmatprep.subr.bf16.mxu0 %v6356_v32  ;;  %v6422_v32 = vld [vmem:[%s7175_s20 + $0x2c0] ss:$12 sps:$4 sm:$0xff]  }
 0x135   : > { %4108 = vmatmul.mubr.bf16.vlgmr.msra.gmra.mrb[0].mxu1 %v7428_v36 }
 0x136   : > { %4231 = vmatmul.mubr.bf16.vlgmr.msra.gmra.mrb[0].mxu0 %v7432_v37  ;;  %5673 = vmatpush3.bf16.msra.mxu1 %v6358_v39  ;;  %v6426_v39 = vld [vmem:[%s7175_s20 + $0xa54] ss:$12 sps:$4 sm:$0xff]  }
 0x137   : > { %4240 = vmatpush1.bf16.msra.mxu0 %v6354_v34  ;;  %5674 = vmatprep.subr.bf16.mxu1 %v6362_v42  ;;  %v6423_v34 = vld [vmem:[%s7175_s20 + $0x200] ss:$12 sps:$4 sm:$0xff]   ;;  %v6424_v42 = vld [vmem:[%s7175_s20 + $0xa50] ss:$12 sps:$4 sm:$0xff]  }
 0x138   : > { %4241 = vmatprep.subr.bf16.mxu0 %v6361_v41  ;;  %4517 = vmatprep.mubr.bf16.mxu1 %v7228_v48  ;;  %v6373_v48 = vld [vmem:[%s7175_s20 + $0x50] ss:$12 sps:$4 sm:$0xff]   ;;  %v6427_v41 = vld [vmem:[%s7175_s20 + $0x2d8] ss:$12 sps:$4 sm:$0xff]  }
 0x139   : > { %4271 = vmatprep.mubr.bf16.mxu0 %v7442_v22 }
 0x13a   : > { %5675 = vmatpush3.bf16.msra.mxu1 %v6363_v23  ;;  %v6431_v23 = vld [vmem:[%s7175_s20 + $0xa6c] ss:$12 sps:$4 sm:$0xff]  }
 0x13b   : > { %4242 = vmatpush1.bf16.msra.mxu0 %v6359_v43  ;;  %5676 = vmatprep.subr.bf16.mxu1 %v6367_v45  ;;  %v6428_v43 = vld [vmem:[%s7175_s20 + $0x218] ss:$12 sps:$4 sm:$0xff]   ;;  %v6429_v45 = vld [vmem:[%s7175_s20 + $0xa68] ss:$12 sps:$4 sm:$0xff]  }
 0x13c   : > { %4243 = vmatprep.subr.bf16.mxu0 %v6366_v44  ;;  %v6432_v44 = vld [vmem:[%s7175_s20 + $0x2f0] ss:$12 sps:$4 sm:$0xff]  }
 0x13e   : > { %5677 = vmatpush3.bf16.msra.mxu1 %v6368_v47  ;;  %v6438_v47 = vld [vmem:[%s7175_s20 + $0xa84] ss:$12 sps:$4 sm:$0xff]  }
 0x13f   : > { %4244 = vmatpush1.bf16.msra.mxu0 %v6364_v46  ;;  %5678 = vmatprep.subr.bf16.mxu1 %v6372_v50  ;;  %v6433_v46 = vld [vmem:[%s7175_s20 + $0x230] ss:$12 sps:$4 sm:$0xff]   ;;  %v6436_v50 = vld [vmem:[%s7175_s20 + $0xa80] ss:$12 sps:$4 sm:$0xff]  }
 0x140   : > { %4245 = vmatprep.subr.bf16.mxu0 %v6371_v49  ;;  %v6439_v49 = vld [vmem:[%s7175_s20 + $0x3c8] ss:$12 sps:$4 sm:$0xff]  }
 0x142   : > { %5679 = vmatpush3.bf16.msra.mxu1 %v6373_v48  ;;  %v7513_v48 = vcombine.low %v7435_v40, %v7435_v40  ;;  %v6441_v40 = vld [vmem:[%s7175_s20 + $0xa98] ss:$12 sps:$4 sm:$0xff]  }
 0x143   : > { %4246 = vmatpush1.bf16.msra.mxu0 %v6369_v51  ;;  %5680 = vmatprep.subr.bf16.mxu1 %v6377_v54  ;;  %v6440_v51 = vld [vmem:[%s7175_s20 + $0x308] ss:$12 sps:$4 sm:$0xff]  }
 0x144   : > { %4247 = vmatprep.subr.bf16.mxu0 %v6376_v52  ;;  %v7515_v52 = vld [vmem:[#allocation2 + $0x38] sm:$0xff] }
 0x145   : > { %v6443_v54 = vld [vmem:[%s7175_s20 + $0xa9c] ss:$12 sps:$4 sm:$0xff]  }
 0x146   : > { %5681 = vmatpush3.bf16.msra.mxu1 %v6378_v56  ;;  %v7521_v56 = vcombine.high %v7515_v52, %v7515_v52 }
 0x147   : > { %4248 = vmatpush1.bf16.msra.mxu0 %v6374_v55  ;;  %5682 = vmatprep.subr.bf16.mxu1 %v6382_v58  ;;  %v6444_v55 = vld [vmem:[%s7175_s20 + $0x3e0] ss:$12 sps:$4 sm:$0xff]  }
 0x148   : > { %4249 = vmatprep.subr.bf16.mxu0 %v6381_v57  ;;  %v6445_v57 = vld [vmem:[%s7175_s20 + $0x320] ss:$12 sps:$4 sm:$0xff]  }
 0x149   : > { %v6448_v58 = vld [vmem:[%s7175_s20 + $0xab4] ss:$12 sps:$4 sm:$0xff]  }
 0x14a   : > { %5683 = vmatpush3.bf16.msra.mxu1 %v6383_v60  ;;  %v6446_v60 = vld [vmem:[%s7175_s20 + $0xab0] ss:$12 sps:$4 sm:$0xff]  }
 0x14b   : > { %4250 = vmatpush1.bf16.msra.mxu0 %v6379_v59  ;;  %5684 = vmatprep.subr.bf16.mxu1 %v6387_v62  ;;  %v6449_v59 = vld [vmem:[%s7175_s20 + $0x3f8] ss:$12 sps:$4 sm:$0xff]   ;;  %v6454_v62 = vld [vmem:[%s7175_s20 + $0x410] ss:$12 sps:$4 sm:$0xff]  }
 0x14c   : > { %4251 = vmatprep.subr.bf16.mxu0 %v6386_v61  ;;  %v6453_v61 = vld [vmem:[%s7175_s20 + $0xacc] ss:$12 sps:$4 sm:$0xff]  }
 0x14e   : > { %5685 = vmatpush3.bf16.msra.mxu1 %v6388_v0  ;;  %v6458_v0 = vld [vmem:[%s7175_s20 + $0xae4] ss:$12 sps:$4 sm:$0xff]  }
 0x14f   : > { %4252 = vmatpush1.bf16.msra.mxu0 %v6384_v63  ;;  %5686 = vmatprep.subr.bf16.mxu1 %v6392_v2  ;;  %v6451_v63 = vld [vmem:[%s7175_s20 + $0xac8] ss:$12 sps:$4 sm:$0xff]   ;;  %v6456_v2 = vld [vmem:[%s7175_s20 + $0xae0] ss:$12 sps:$4 sm:$0xff]  }
 0x150   : > { %4253 = vmatprep.subr.bf16.mxu0 %v6391_v1  ;;  %v6459_v1 = vld [vmem:[%s7175_s20 + $0x428] ss:$12 sps:$4 sm:$0xff]  }
 0x152   : > { %5687 = vmatpush3.bf16.msra.mxu1 %v6393_v4  ;;  %v6463_v4 = vld [vmem:[%s7175_s20 + $0xafc] ss:$12 sps:$4 sm:$0xff]  }
 0x153   : > { %4254 = vmatpush1.bf16.msra.mxu0 %v6389_v3  ;;  %5694 = vmatprep.subr.bf16.mxu1 %v6397_v8  ;;  %v6460_v3 = vld [vmem:[%s7175_s20 + $0x368] ss:$12 sps:$4 sm:$0xff]   ;;  %v6461_v8 = vld [vmem:[%s7175_s20 + $0xaf8] ss:$12 sps:$4 sm:$0xff]  }
 0x154   : > { %4255 = vmatprep.subr.bf16.mxu0 %v6396_v5  ;;  %v6464_v5 = vld [vmem:[%s7175_s20 + $0x440] ss:$12 sps:$4 sm:$0xff]  }
 0x155   : > { %4518 = vmatmul.mubr.bf16.vlgmr.msra.gmra.mrb[4].mxu1 %v7253_v6  ;;  %v6411_v6 = vld [vmem:[%s7175_s20 + $0xa0c] ss:$12 sps:$4 sm:$0xff]  }
 0x156   : > { %5695 = vmatpush3.bf16.msra.mxu1 %v6398_v10  ;;  %4557 = vmatprep.mubr.bf16.mxu1 %v7289_v35  ;;  %v6416_v35 = vld [vmem:[%s7175_s20 + $0xa24] ss:$12 sps:$4 sm:$0xff]   ;;  %v6468_v10 = vld [vmem:[%s7175_s20 + $0xb14] ss:$12 sps:$4 sm:$0xff]  }
 0x157   : > { %4256 = vmatpush1.bf16.msra.mxu0 %v6394_v9  ;;  %5696 = vmatprep.subr.bf16.mxu1 %v6402_v12  ;;  %v6465_v9 = vld [vmem:[%s7175_s20 + $0x380] ss:$12 sps:$4 sm:$0xff]   ;;  %v6466_v12 = vld [vmem:[%s7175_s20 + $0xb10] ss:$12 sps:$4 sm:$0xff]  }
 0x158   : > { %4257 = vmatprep.subr.bf16.mxu0 %v6401_v11  ;;  %v6469_v11 = vld [vmem:[%s7175_s20 + $0x458] ss:$12 sps:$4 sm:$0xff]  }
 0x15a   : > { %5697 = vmatpush3.bf16.msra.mxu1 %v6403_v14  ;;  %v6473_v14 = vld [vmem:[%s7175_s20 + $0xb2c] ss:$12 sps:$4 sm:$0xff]  }
 0x15b   : > { %4258 = vmatpush1.bf16.msra.mxu0 %v6399_v13  ;;  %5698 = vmatprep.subr.bf16.mxu1 %v6407_v17  ;;  %v6470_v13 = vld [vmem:[%s7175_s20 + $0x398] ss:$12 sps:$4 sm:$0xff]   ;;  %v6471_v17 = vld [vmem:[%s7175_s20 + $0xb28] ss:$12 sps:$4 sm:$0xff]  }
 0x15c   : > { %4259 = vmatprep.subr.bf16.mxu0 %v6406_v15  ;;  %v6474_v15 = vld [vmem:[%s7175_s20 + $0x470] ss:$12 sps:$4 sm:$0xff]  }
 0x15e   : > { %5699 = vmatpush3.bf16.msra.mxu1 %v6408_v20  ;;  %v6478_v20 = vld [vmem:[%s7175_s20 + $0xb44] ss:$12 sps:$4 sm:$0xff]  }
 0x15f   : > { %4260 = vmatpush1.bf16.msra.mxu0 %v6404_v19  ;;  %5700 = vmatprep.subr.bf16.mxu1 %v6412_v21  ;;  %v6475_v19 = vld [vmem:[%s7175_s20 + $0x3b0] ss:$12 sps:$4 sm:$0xff]   ;;  %v6476_v21 = vld [vmem:[%s7175_s20 + $0xb40] ss:$12 sps:$4 sm:$0xff]  }
 0x160   : > { %4261 = vmatprep.subr.bf16.mxu0 %v6411_v6  ;;  %v6479_v6 = vld [vmem:[%s7175_s20 + $0x548] ss:$12 sps:$4 sm:$0xff]  }
 0x162   : > { %5701 = vmatpush3.bf16.msra.mxu1 %v6413_v27  ;;  %v6483_v27 = vld [vmem:[%s7175_s20 + $0xb5c] ss:$12 sps:$4 sm:$0xff]  }
 0x163   : > { %4262 = vmatpush1.bf16.msra.mxu0 %v6409_v24  ;;  %5702 = vmatprep.subr.bf16.mxu1 %v6417_v28  ;;  %v6480_v24 = vld [vmem:[%s7175_s20 + $0x488] ss:$12 sps:$4 sm:$0xff]   ;;  %v6481_v28 = vld [vmem:[%s7175_s20 + $0xb58] ss:$12 sps:$4 sm:$0xff]  }
 0x164   : > { %4263 = vmatprep.subr.bf16.mxu0 %v6416_v35  ;;  %v6484_v35 = vld [vmem:[%s7175_s20 + $0x560] ss:$12 sps:$4 sm:$0xff]  }
 0x166   : > { %5703 = vmatpush3.bf16.msra.mxu1 %v6418_v30  ;;  %v6488_v30 = vld [vmem:[%s7175_s20 + $0xb74] ss:$12 sps:$4 sm:$0xff]  }
 0x167   : > { %4264 = vmatpush1.bf16.msra.mxu0 %v6414_v29  ;;  %5704 = vmatprep.subr.bf16.mxu1 %v6422_v32  ;;  %v6485_v29 = vld [vmem:[%s7175_s20 + $0x4a0] ss:$12 sps:$4 sm:$0xff]   ;;  %v6486_v32 = vld [vmem:[%s7175_s20 + $0xb70] ss:$12 sps:$4 sm:$0xff]  }
 0x168   : > { %4265 = vmatprep.subr.bf16.mxu0 %v6421_v31  ;;  %v6489_v31 = vld [vmem:[%s7175_s20 + $0x578] ss:$12 sps:$4 sm:$0xff]  }
 0x16a   : > { %5705 = vmatpush3.bf16.msra.mxu1 %v6423_v34  ;;  %v6494_v34 = vld [vmem:[%s7175_s20 + $0x590] ss:$12 sps:$4 sm:$0xff]  }
 0x16b   : > { %4266 = vmatpush1.bf16.msra.mxu0 %v6419_v33  ;;  %5706 = vmatprep.subr.bf16.mxu1 %v6427_v41  ;;  %v6490_v33 = vld [vmem:[%s7175_s20 + $0x4b8] ss:$12 sps:$4 sm:$0xff]   ;;  %v6495_v41 = vld [vmem:[%s7175_s20 + $0x4d0] ss:$12 sps:$4 sm:$0xff]  }
 0x16c   : > { %4267 = vmatprep.subr.bf16.mxu0 %v6426_v39  ;;  %v6491_v39 = vld [vmem:[%s7175_s20 + $0xb88] ss:$12 sps:$4 sm:$0xff]  }
 0x16e   : > { %5707 = vmatpush3.bf16.msra.mxu1 %v6428_v43  ;;  %v6496_v43 = vld [vmem:[%s7175_s20 + $0xba0] ss:$12 sps:$4 sm:$0xff]  }
 0x16f   : > { %4268 = vmatpush1.bf16.msra.mxu0 %v6424_v42  ;;  %5708 = vmatprep.subr.bf16.mxu1 %v6432_v44  ;;  %v6499_v42 = vld [vmem:[%s7175_s20 + $0x5a8] ss:$12 sps:$4 sm:$0xff]  }
 0x170   : > { %4269 = vmatprep.subr.bf16.mxu0 %v6431_v23  ;;  %v6500_v23 = vld [vmem:[%s7175_s20 + $0x4e8] ss:$12 sps:$4 sm:$0xff]  }
 0x171   : > { %v6503_v44 = vld [vmem:[%s7175_s20 + $0xbbc] ss:$12 sps:$4 sm:$0xff]  }
 0x172   : > { %5709 = vmatpush3.bf16.msra.mxu1 %v6433_v46  ;;  %v6501_v46 = vld [vmem:[%s7175_s20 + $0xbb8] ss:$12 sps:$4 sm:$0xff]  }
 0x173   : > { %4270 = vmatpush1.bf16.msra.mxu0 %v6429_v45  ;;  %5716 = vmatprep.subr.bf16.mxu1 %v6439_v49  ;;  %v6504_v45 = vld [vmem:[%s7175_s20 + $0x5c0] ss:$12 sps:$4 sm:$0xff]  }
 0x174   : > { %4280 = vmatprep.subr.bf16.mxu0 %v6438_v47  ;;  %v6505_v47 = vld [vmem:[%s7175_s20 + $0x500] ss:$12 sps:$4 sm:$0xff]  }
 0x175   : > { %4558 = vmatmul.mubr.bf16.vlgmr.msra.gmra.mrb[8].mxu1 %v7339_v16  ;;  %v6450_v16 = vld [vmem:[%s7175_s20 + $0x338] ss:$12 sps:$4 sm:$0xff]   ;;  %v6508_v49 = vld [vmem:[%s7175_s20 + $0xbd4] ss:$12 sps:$4 sm:$0xff]  }
 0x176   : > { %4272 = vmatmul.mubr.bf16.vlgmr.msra.gmra.mrb[0].mxu0 %v7513_v48  ;;  %5717 = vmatpush3.bf16.msra.mxu1 %v6440_v51  ;;  %v6506_v51 = vld [vmem:[%s7175_s20 + $0xbd0] ss:$12 sps:$4 sm:$0xff]  }
 0x177   : > { %4281 = vmatpush1.bf16.msra.mxu0 %v6436_v50  ;;  %5718 = vmatprep.subr.bf16.mxu1 %v6444_v55  ;;  %v6509_v50 = vld [vmem:[%s7175_s20 + $0x5d8] ss:$12 sps:$4 sm:$0xff]  }
 0x178   : > { %4282 = vmatprep.subr.bf16.mxu0 %v6443_v54  ;;  %4597 = vmatprep.mubr.bf16.mxu1 %v7356_v25  ;;  %v6455_v25 = vld [vmem:[%s7175_s20 + $0x350] ss:$12 sps:$4 sm:$0xff]   ;;  %v6510_v54 = vld [vmem:[%s7175_s20 + $0x518] ss:$12 sps:$4 sm:$0xff]  }
 0x179   : > { %4312 = vmatprep.mubr.bf16.mxu0 %v7521_v56  ;;  %v6513_v55 = vld [vmem:[%s7175_s20 + $0xbec] ss:$12 sps:$4 sm:$0xff]  }
 0x17a   : > { %5719 = vmatpush3.bf16.msra.mxu1 %v6445_v57  ;;  %v6511_v57 = vld [vmem:[%s7175_s20 + $0xbe8] ss:$12 sps:$4 sm:$0xff]  }
 0x17b   : > { %4283 = vmatpush1.bf16.msra.mxu0 %v6441_v40  ;;  %5720 = vmatprep.subr.bf16.mxu1 %v6449_v59  ;;  %v6514_v40 = vld [vmem:[%s7175_s20 + $0x5f0] ss:$12 sps:$4 sm:$0xff]  }
 0x17c   : > { %4284 = vmatprep.subr.bf16.mxu0 %v6448_v58  ;;  %v6515_v58 = vld [vmem:[%s7175_s20 + $0x530] ss:$12 sps:$4 sm:$0xff]  }
 0x17d   : > { %v6520_v59 = vld [vmem:[%s7175_s20 + $0xc04] ss:$12 sps:$4 sm:$0xff]  }
 0x17e   : > { %5721 = vmatpush3.bf16.msra.mxu1 %v6450_v16  ;;  %v6518_v16 = vld [vmem:[%s7175_s20 + $0xc00] ss:$12 sps:$4 sm:$0xff]  }
 0x17f   : > { %4285 = vmatpush1.bf16.msra.mxu0 %v6446_v60  ;;  %5722 = vmatprep.subr.bf16.mxu1 %v6454_v62  ;;  %v6521_v60 = vld [vmem:[%s7175_s20 + $0x6c8] ss:$12 sps:$4 sm:$0xff]   ;;  %v7593_v62 = vcombine.low %v7515_v52, %v7515_v52  ;;  %v6523_v52 = vld [vmem:[%s7175_s20 + $0xc18] ss:$12 sps:$4 sm:$0xff]  }
 0x180   : > { %4286 = vmatprep.subr.bf16.mxu0 %v6453_v61  ;;  %v6522_v61 = vld [vmem:[%s7175_s20 + $0x608] ss:$12 sps:$4 sm:$0xff]  }
 0x182   : > { %5723 = vmatpush3.bf16.msra.mxu1 %v6455_v25  ;;  %v6525_v25 = vld [vmem:[%s7175_s20 + $0xc1c] ss:$12 sps:$4 sm:$0xff]  }
 0x183   : > { %4287 = vmatpush1.bf16.msra.mxu0 %v6451_v63  ;;  %5724 = vmatprep.subr.bf16.mxu1 %v6459_v1  ;;  %v7595_v63 = vld [vmem:[#allocation2 + $0x40] sm:$0xff] }
 0x184   : > { %4288 = vmatprep.subr.bf16.mxu0 %v6458_v0  ;;  %v6526_v0 = vld [vmem:[%s7175_s20 + $0x6e0] ss:$12 sps:$4 sm:$0xff]   ;;  %v7601_v1 = vcombine.high %v7595_v63, %v7595_v63 }
 0x186   : > { %5725 = vmatpush3.bf16.msra.mxu1 %v6460_v3  ;;  %v6530_v3 = vld [vmem:[%s7175_s20 + $0xc34] ss:$12 sps:$4 sm:$0xff]  }
 0x187   : > { %4289 = vmatpush1.bf16.msra.mxu0 %v6456_v2  ;;  %5726 = vmatprep.subr.bf16.mxu1 %v6464_v5  ;;  %v6527_v2 = vld [vmem:[%s7175_s20 + $0x620] ss:$12 sps:$4 sm:$0xff]   ;;  %v6528_v5 = vld [vmem:[%s7175_s20 + $0xc30] ss:$12 sps:$4 sm:$0xff]  }
 0x188   : > { %4290 = vmatprep.subr.bf16.mxu0 %v6463_v4  ;;  %v6531_v4 = vld [vmem:[%s7175_s20 + $0x6f8] ss:$12 sps:$4 sm:$0xff]  }
 0x18a   : > { %5727 = vmatpush3.bf16.msra.mxu1 %v6465_v9  ;;  %v6536_v9 = vld [vmem:[%s7175_s20 + $0x710] ss:$12 sps:$4 sm:$0xff]  }
 0x18b   : > { %4291 = vmatpush1.bf16.msra.mxu0 %v6461_v8  ;;  %5728 = vmatprep.subr.bf16.mxu1 %v6469_v11  ;;  %v6535_v8 = vld [vmem:[%s7175_s20 + $0xc4c] ss:$12 sps:$4 sm:$0xff]   ;;  %v6540_v11 = vld [vmem:[%s7175_s20 + $0xc64] ss:$12 sps:$4 sm:$0xff]  }
 0x18c   : > { %4292 = vmatprep.subr.bf16.mxu0 %v6468_v10  ;;  %v6533_v10 = vld [vmem:[%s7175_s20 + $0xc48] ss:$12 sps:$4 sm:$0xff]  }
 0x18e   : > { %5729 = vmatpush3.bf16.msra.mxu1 %v6470_v13  ;;  %v6538_v13 = vld [vmem:[%s7175_s20 + $0xc60] ss:$12 sps:$4 sm:$0xff]  }
 0x18f   : > { %4293 = vmatpush1.bf16.msra.mxu0 %v6466_v12  ;;  %5730 = vmatprep.subr.bf16.mxu1 %v6474_v15  ;;  %v6541_v12 = vld [vmem:[%s7175_s20 + $0x728] ss:$12 sps:$4 sm:$0xff]  }
 0x190   : > { %4294 = vmatprep.subr.bf16.mxu0 %v6473_v14  ;;  %v6542_v14 = vld [vmem:[%s7175_s20 + $0x668] ss:$12 sps:$4 sm:$0xff]  }
 0x191   : > { %v6545_v15 = vld [vmem:[%s7175_s20 + $0xc7c] ss:$12 sps:$4 sm:$0xff]  }
 0x192   : > { %5731 = vmatpush3.bf16.msra.mxu1 %v6475_v19  ;;  %v6543_v19 = vld [vmem:[%s7175_s20 + $0xc78] ss:$12 sps:$4 sm:$0xff]  }
 0x193   : > { %4295 = vmatpush1.bf16.msra.mxu0 %v6471_v17  ;;  %5738 = vmatprep.subr.bf16.mxu1 %v6479_v6  ;;  %v6546_v17 = vld [vmem:[%s7175_s20 + $0x740] ss:$12 sps:$4 sm:$0xff]  }
 0x194   : > { %4296 = vmatprep.subr.bf16.mxu0 %v6478_v20  ;;  %v6547_v20 = vld [vmem:[%s7175_s20 + $0x680] ss:$12 sps:$4 sm:$0xff]  }
 0x195   : > { %4598 = vmatmul.mubr.bf16.vlgmr.msra.gmra.mrb[12].mxu1 %v7428_v36  ;;  %v6493_v36 = vld [vmem:[%s7175_s20 + $0xb8c] ss:$12 sps:$4 sm:$0xff]   ;;  %v6550_v6 = vld [vmem:[%s7175_s20 + $0xc94] ss:$12 sps:$4 sm:$0xff]  }
 0x196   : > { %5739 = vmatpush3.bf16.msra.mxu1 %v6480_v24  ;;  %4637 = vmatprep.mubr.bf16.mxu1 %v7233_v53  ;;  %v6498_v53 = vld [vmem:[%s7175_s20 + $0xba4] ss:$12 sps:$4 sm:$0xff]  }
 0x197   : > { %4297 = vmatpush1.bf16.msra.mxu0 %v6476_v21  ;;  %5740 = vmatprep.subr.bf16.mxu1 %v6484_v35  ;;  %v6551_v21 = vld [vmem:[%s7175_s20 + $0x758] ss:$12 sps:$4 sm:$0xff]   ;;  %v6548_v24 = vld [vmem:[%s7175_s20 + $0xc90] ss:$12 sps:$4 sm:$0xff]  }
 0x198   : > { %4298 = vmatprep.subr.bf16.mxu0 %v6483_v27  ;;  %v6552_v27 = vld [vmem:[%s7175_s20 + $0x698] ss:$12 sps:$4 sm:$0xff]  }
 0x199   : > { %v6555_v35 = vld [vmem:[%s7175_s20 + $0xcac] ss:$12 sps:$4 sm:$0xff]  }
 0x19a   : > { %5741 = vmatpush3.bf16.msra.mxu1 %v6485_v29  ;;  %v6553_v29 = vld [vmem:[%s7175_s20 + $0xca8] ss:$12 sps:$4 sm:$0xff]  }
 0x19b   : > { %4299 = vmatpush1.bf16.msra.mxu0 %v6481_v28  ;;  %5742 = vmatprep.subr.bf16.mxu1 %v6489_v31  ;;  %v6556_v28 = vld [vmem:[%s7175_s20 + $0x770] ss:$12 sps:$4 sm:$0xff]  }
 0x19c   : > { %4300 = vmatprep.subr.bf16.mxu0 %v6488_v30  ;;  %v6557_v30 = vld [vmem:[%s7175_s20 + $0x6b0] ss:$12 sps:$4 sm:$0xff]  }
 0x19d   : > { %v6560_v31 = vld [vmem:[%s7175_s20 + $0xcc4] ss:$12 sps:$4 sm:$0xff]  }
 0x19e   : > { %5743 = vmatpush3.bf16.msra.mxu1 %v6490_v33  ;;  %v6558_v33 = vld [vmem:[%s7175_s20 + $0xcc0] ss:$12 sps:$4 sm:$0xff]  }
 0x19f   : > { %4301 = vmatpush1.bf16.msra.mxu0 %v6486_v32  ;;  %5744 = vmatprep.subr.bf16.mxu1 %v6494_v34  ;;  %v6561_v32 = vld [vmem:[%s7175_s20 + $0x848] ss:$12 sps:$4 sm:$0xff]  }
 0x1a0   : > { %4302 = vmatprep.subr.bf16.mxu0 %v6493_v36  ;;  %v6562_v36 = vld [vmem:[%s7175_s20 + $0x788] ss:$12 sps:$4 sm:$0xff]  }
 0x1a1   : > { %v6565_v34 = vld [vmem:[%s7175_s20 + $0xcdc] ss:$12 sps:$4 sm:$0xff]  }
 0x1a2   : > { %5745 = vmatpush3.bf16.msra.mxu1 %v6495_v41  ;;  %v6563_v41 = vld [vmem:[%s7175_s20 + $0xcd8] ss:$12 sps:$4 sm:$0xff]  }
 0x1a3   : > { %4303 = vmatpush1.bf16.msra.mxu0 %v6491_v39  ;;  %5746 = vmatprep.subr.bf16.mxu1 %v6499_v42  ;;  %v6566_v39 = vld [vmem:[%s7175_s20 + $0x860] ss:$12 sps:$4 sm:$0xff]  }
 0x1a4   : > { %4304 = vmatprep.subr.bf16.mxu0 %v6498_v53  ;;  %v6567_v53 = vld [vmem:[%s7175_s20 + $0x7a0] ss:$12 sps:$4 sm:$0xff]  }
 0x1a5   : > { %v6570_v42 = vld [vmem:[%s7175_s20 + $0xcf4] ss:$12 sps:$4 sm:$0xff]  }
 0x1a6   : > { %5747 = vmatpush3.bf16.msra.mxu1 %v6500_v23  ;;  %v6568_v23 = vld [vmem:[%s7175_s20 + $0xcf0] ss:$12 sps:$4 sm:$0xff]  }
 0x1a7   : > { %4305 = vmatpush1.bf16.msra.mxu0 %v6496_v43  ;;  %5748 = vmatprep.subr.bf16.mxu1 %v6504_v45  ;;  %v6571_v43 = vld [vmem:[%s7175_s20 + $0x878] ss:$12 sps:$4 sm:$0xff]   ;;  %v6576_v45 = vld [vmem:[%s7175_s20 + $0x890] ss:$12 sps:$4 sm:$0xff]  }
 0x1a8   : > { %4306 = vmatprep.subr.bf16.mxu0 %v6503_v44  ;;  %v6572_v44 = vld [vmem:[%s7175_s20 + $0x7b8] ss:$12 sps:$4 sm:$0xff]  }
 0x1aa   : > { %5749 = vmatpush3.bf16.msra.mxu1 %v6505_v47  ;;  %v6577_v47 = vld [vmem:[%s7175_s20 + $0x7d0] ss:$12 sps:$4 sm:$0xff]  }
 0x1ab   : > { %4307 = vmatpush1.bf16.msra.mxu0 %v6501_v46  ;;  %5750 = vmatprep.subr.bf16.mxu1 %v6509_v50  ;;  %v6573_v46 = vld [vmem:[%s7175_s20 + $0xd08] ss:$12 sps:$4 sm:$0xff]   ;;  %v6578_v50 = vld [vmem:[%s7175_s20 + $0xd20] ss:$12 sps:$4 sm:$0xff]  }
 0x1ac   : > { %4308 = vmatprep.subr.bf16.mxu0 %v6508_v49  ;;  %v6581_v49 = vld [vmem:[%s7175_s20 + $0x8a8] ss:$12 sps:$4 sm:$0xff]  }
 0x1ae   : > { %5751 = vmatpush3.bf16.msra.mxu1 %v6510_v54  ;;  %v6585_v54 = vld [vmem:[%s7175_s20 + $0xd3c] ss:$12 sps:$4 sm:$0xff]  }
 0x1af   : > { %4309 = vmatpush1.bf16.msra.mxu0 %v6506_v51  ;;  %5752 = vmatprep.subr.bf16.mxu1 %v6514_v40  ;;  %v6582_v51 = vld [vmem:[%s7175_s20 + $0x7e8] ss:$12 sps:$4 sm:$0xff]   ;;  %v6583_v40 = vld [vmem:[%s7175_s20 + $0xd38] ss:$12 sps:$4 sm:$0xff]  }
 0x1b0   : > { %4310 = vmatprep.subr.bf16.mxu0 %v6513_v55  ;;  %v6586_v55 = vld [vmem:[%s7175_s20 + $0x8c0] ss:$12 sps:$4 sm:$0xff]  }
 0x1b2   : > { %5753 = vmatpush3.bf16.msra.mxu1 %v6515_v58  ;;  %v6590_v58 = vld [vmem:[%s7175_s20 + $0xd54] ss:$12 sps:$4 sm:$0xff]  }
 0x1b3   : > { %4311 = vmatpush1.bf16.msra.mxu0 %v6511_v57  ;;  %5760 = vmatprep.subr.bf16.mxu1 %v6521_v60  ;;  %v6587_v57 = vld [vmem:[%s7175_s20 + $0x800] ss:$12 sps:$4 sm:$0xff]   ;;  %v6588_v60 = vld [vmem:[%s7175_s20 + $0xd50] ss:$12 sps:$4 sm:$0xff]  }
 0x1b4   : > { %4321 = vmatprep.subr.bf16.mxu0 %v6520_v59  ;;  %v6591_v59 = vld [vmem:[%s7175_s20 + $0x8d8] ss:$12 sps:$4 sm:$0xff]  }
 0x1b5   : > { %4638 = vmatmul.mubr.bf16.vlgmr.msra.gmra.mrb[16].mxu1 %v7255_v7  ;;  %v6532_v7 = vld [vmem:[%s7175_s20 + $0x638] ss:$12 sps:$4 sm:$0xff]  }
 0x1b6   : > { %4313 = vmatmul.mubr.bf16.vlgmr.msra.gmra.mrb[0].mxu0 %v7593_v62  ;;  %5761 = vmatpush3.bf16.msra.mxu1 %v6522_v61  ;;  %v6595_v61 = vld [vmem:[%s7175_s20 + $0xd6c] ss:$12 sps:$4 sm:$0xff]  }
 0x1b7   : > { %4322 = vmatpush1.bf16.msra.mxu0 %v6518_v16  ;;  %5762 = vmatprep.subr.bf16.mxu1 %v6526_v0  ;;  %v6592_v16 = vld [vmem:[%s7175_s20 + $0x818] ss:$12 sps:$4 sm:$0xff]   ;;  %v6593_v0 = vld [vmem:[%s7175_s20 + $0xd68] ss:$12 sps:$4 sm:$0xff]  }
 0x1b8   : > { %4323 = vmatprep.subr.bf16.mxu0 %v6525_v25  ;;  %4677 = vmatprep.mubr.bf16.mxu1 %v7296_v38  ;;  %v6537_v38 = vld [vmem:[%s7175_s20 + $0x650] ss:$12 sps:$4 sm:$0xff]  }
 0x1b9   : > { %4353 = vmatprep.mubr.bf16.mxu0 %v7601_v1  ;;  %v6596_v25 = vld [vmem:[%s7175_s20 + $0x8f0] ss:$12 sps:$4 sm:$0xff]  }
 0x1ba   : > { %5763 = vmatpush3.bf16.msra.mxu1 %v6527_v2  ;;  %v6602_v2 = vld [vmem:[%s7175_s20 + $0xd84] ss:$12 sps:$4 sm:$0xff]  }
 0x1bb   : > { %4324 = vmatpush1.bf16.msra.mxu0 %v6523_v52  ;;  %5764 = vmatprep.subr.bf16.mxu1 %v6531_v4  ;;  %v6597_v52 = vld [vmem:[%s7175_s20 + $0x830] ss:$12 sps:$4 sm:$0xff]   ;;  %v6600_v4 = vld [vmem:[%s7175_s20 + $0xd80] ss:$12 sps:$4 sm:$0xff]  }
 0x1bc   : > { %4325 = vmatprep.subr.bf16.mxu0 %v6530_v3  ;;  %v6603_v3 = vld [vmem:[%s7175_s20 + $0x9c8] ss:$12 sps:$4 sm:$0xff]  }
 0x1be   : > { %5765 = vmatpush3.bf16.msra.mxu1 %v6532_v7  ;;  %v7673_v7 = vcombine.low %v7595_v63, %v7595_v63  ;;  %v6605_v63 = vld [vmem:[%s7175_s20 + $0xd98] ss:$12 sps:$4 sm:$0xff]  }
 0x1bf   : > { %4326 = vmatpush1.bf16.msra.mxu0 %v6528_v5  ;;  %5766 = vmatprep.subr.bf16.mxu1 %v6536_v9  ;;  %v6604_v5 = vld [vmem:[%s7175_s20 + $0x908] ss:$12 sps:$4 sm:$0xff]  }
 0x1c0   : > { %4327 = vmatprep.subr.bf16.mxu0 %v6535_v8  ;;  %v7675_v8 = vld [vmem:[#allocation2 + $0x48] sm:$0xff] }
 0x1c1   : > { %v6607_v9 = vld [vmem:[%s7175_s20 + $0xd9c] ss:$12 sps:$4 sm:$0xff]  }
 0x1c2   : > { %5767 = vmatpush3.bf16.msra.mxu1 %v6537_v38  ;;  %v7681_v38 = vcombine.high %v7675_v8, %v7675_v8 }
 0x1c3   : > { %4328 = vmatpush1.bf16.msra.mxu0 %v6533_v10  ;;  %5768 = vmatprep.subr.bf16.mxu1 %v6541_v12  ;;  %v6608_v10 = vld [vmem:[%s7175_s20 + $0x9e0] ss:$12 sps:$4 sm:$0xff]  }
 0x1c4   : > { %4329 = vmatprep.subr.bf16.mxu0 %v6540_v11  ;;  %v6609_v11 = vld [vmem:[%s7175_s20 + $0x920] ss:$12 sps:$4 sm:$0xff]  }
 0x1c5   : > { %v6612_v12 = vld [vmem:[%s7175_s20 + $0xdb4] ss:$12 sps:$4 sm:$0xff]  }
 0x1c6   : > { %5769 = vmatpush3.bf16.msra.mxu1 %v6542_v14  ;;  %v6614_v14 = vld [vmem:[%s7175_s20 + $0x938] ss:$12 sps:$4 sm:$0xff]  }
 0x1c7   : > { %4330 = vmatpush1.bf16.msra.mxu0 %v6538_v13  ;;  %5770 = vmatprep.subr.bf16.mxu1 %v6546_v17  ;;  %v6613_v13 = vld [vmem:[%s7175_s20 + $0x9f8] ss:$12 sps:$4 sm:$0xff]   ;;  %v6618_v17 = vld [vmem:[%s7175_s20 + $0xa10] ss:$12 sps:$4 sm:$0xff]  }
 0x1c8   : > { %4331 = vmatprep.subr.bf16.mxu0 %v6545_v15  ;;  %v6617_v15 = vld [vmem:[%s7175_s20 + $0xdcc] ss:$12 sps:$4 sm:$0xff]  }
 0x1ca   : > { %5771 = vmatpush3.bf16.msra.mxu1 %v6547_v20  ;;  %v6619_v20 = vld [vmem:[%s7175_s20 + $0x950] ss:$12 sps:$4 sm:$0xff]  }
 0x1cb   : > { %4332 = vmatpush1.bf16.msra.mxu0 %v6543_v19  ;;  %5772 = vmatprep.subr.bf16.mxu1 %v6551_v21  ;;  %v6615_v19 = vld [vmem:[%s7175_s20 + $0xdc8] ss:$12 sps:$4 sm:$0xff]   ;;  %v6620_v21 = vld [vmem:[%s7175_s20 + $0xde0] ss:$12 sps:$4 sm:$0xff]  }
 0x1cc   : > { %4333 = vmatprep.subr.bf16.mxu0 %v6550_v6  ;;  %v6623_v6 = vld [vmem:[%s7175_s20 + $0xa28] ss:$12 sps:$4 sm:$0xff]  }
 0x1ce   : > { %5773 = vmatpush3.bf16.msra.mxu1 %v6552_v27  ;;  %v6627_v27 = vld [vmem:[%s7175_s20 + $0xdfc] ss:$12 sps:$4 sm:$0xff]  }
 0x1cf   : > { %4334 = vmatpush1.bf16.msra.mxu0 %v6548_v24  ;;  %5774 = vmatprep.subr.bf16.mxu1 %v6556_v28  ;;  %v6624_v24 = vld [vmem:[%s7175_s20 + $0x968] ss:$12 sps:$4 sm:$0xff]   ;;  %v6625_v28 = vld [vmem:[%s7175_s20 + $0xdf8] ss:$12 sps:$4 sm:$0xff]  }
 0x1d0   : > { %4335 = vmatprep.subr.bf16.mxu0 %v6555_v35  ;;  %v6628_v35 = vld [vmem:[%s7175_s20 + $0xa40] ss:$12 sps:$4 sm:$0xff]  }
 0x1d2   : > { %5775 = vmatpush3.bf16.msra.mxu1 %v6557_v30  ;;  %v6632_v30 = vld [vmem:[%s7175_s20 + $0xe14] ss:$12 sps:$4 sm:$0xff]  }
 0x1d3   : > { %4336 = vmatpush1.bf16.msra.mxu0 %v6553_v29  ;;  %5782 = vmatprep.subr.bf16.mxu1 %v6561_v32  ;;  %v6629_v29 = vld [vmem:[%s7175_s20 + $0x980] ss:$12 sps:$4 sm:$0xff]  }
 0x1d4   : > { %4337 = vmatprep.subr.bf16.mxu0 %v6560_v31  ;;  %v6633_v31 = vld [vmem:[%s7175_s20 + $0xa58] ss:$12 sps:$4 sm:$0xff]  }
 0x1d5   : > { %4678 = vmatmul.mubr.bf16.vlgmr.msra.gmra.mrb[20].mxu1 %v7344_v18  ;;  %v6575_v18 = vld [vmem:[%s7175_s20 + $0xd0c] ss:$12 sps:$4 sm:$0xff]  }
 0x1d6   : > { %5783 = vmatpush3.bf16.msra.mxu1 %v6562_v36  ;;  %4717 = vmatprep.mubr.bf16.mxu1 %v7360_v26  ;;  %v6580_v26 = vld [vmem:[%s7175_s20 + $0xd24] ss:$12 sps:$4 sm:$0xff]  }
 0x1d7   : > { %4338 = vmatpush1.bf16.msra.mxu0 %v6558_v33  ;;  %5784 = vmatprep.subr.bf16.mxu1 %v6566_v39  ;;  %v6630_v33 = vld [vmem:[%s7175_s20 + $0xe10] ss:$12 sps:$4 sm:$0xff]   ;;  %v6634_v36 = vld [vmem:[%s7175_s20 + $0x998] ss:$12 sps:$4 sm:$0xff]  }
 0x1d8   : > { %4339 = vmatprep.subr.bf16.mxu0 %v6565_v34 }
 0x1da   : > { %5785 = vmatpush3.bf16.msra.mxu1 %v6567_v53 }
 0x1db   : > { %4340 = vmatpush1.bf16.msra.mxu0 %v6563_v41  ;;  %5786 = vmatprep.subr.bf16.mxu1 %v6571_v43  ;;  %v6637_v41 = vld [vmem:[%s7175_s20 + $0xe2c] ss:$12 sps:$4 sm:$0xff]   ;;  %v6635_v43 = vld [vmem:[%s7175_s20 + $0xe28] ss:$12 sps:$4 sm:$0xff]  }
 0x1dc   : > { %4341 = vmatprep.subr.bf16.mxu0 %v6570_v42  ;;  %v6638_v42 = vld [vmem:[%s7175_s20 + $0xa70] ss:$12 sps:$4 sm:$0xff]  }
 0x1de   : > { %5787 = vmatpush3.bf16.msra.mxu1 %v6572_v44  ;;  %v6642_v44 = vld [vmem:[%s7175_s20 + $0xe44] ss:$12 sps:$4 sm:$0xff]  }
 0x1df   : > { %4342 = vmatpush1.bf16.msra.mxu0 %v6568_v23  ;;  %5788 = vmatprep.subr.bf16.mxu1 %v6576_v45  ;;  %v6639_v23 = vld [vmem:[%s7175_s20 + $0x9b0] ss:$12 sps:$4 sm:$0xff]   ;;  %v6640_v45 = vld [vmem:[%s7175_s20 + $0xe40] ss:$12 sps:$4 sm:$0xff]  }
 0x1e0   : > { %4343 = vmatprep.subr.bf16.mxu0 %v6575_v18  ;;  %v6643_v18 = vld [vmem:[%s7175_s20 + $0xb48] ss:$12 sps:$4 sm:$0xff]  }
 0x1e2   : > { %5789 = vmatpush3.bf16.msra.mxu1 %v6577_v47  ;;  %v6647_v47 = vld [vmem:[%s7175_s20 + $0xe5c] ss:$12 sps:$4 sm:$0xff]  }
 0x1e3   : > { %4344 = vmatpush1.bf16.msra.mxu0 %v6573_v46  ;;  %5790 = vmatprep.subr.bf16.mxu1 %v6581_v49  ;;  %v6644_v46 = vld [vmem:[%s7175_s20 + $0xa88] ss:$12 sps:$4 sm:$0xff]   ;;  %v6645_v49 = vld [vmem:[%s7175_s20 + $0xe58] ss:$12 sps:$4 sm:$0xff]  }
 0x1e4   : > { %4345 = vmatprep.subr.bf16.mxu0 %v6580_v26  ;;  %v6648_v26 = vld [vmem:[%s7175_s20 + $0xb60] ss:$12 sps:$4 sm:$0xff]  }
 0x1e6   : > { %5791 = vmatpush3.bf16.msra.mxu1 %v6582_v51  ;;  %v6652_v51 = vld [vmem:[%s7175_s20 + $0xe74] ss:$12 sps:$4 sm:$0xff]  }
 0x1e7   : > { %4346 = vmatpush1.bf16.msra.mxu0 %v6578_v50  ;;  %5792 = vmatprep.subr.bf16.mxu1 %v6586_v55  ;;  %v6649_v50 = vld [vmem:[%s7175_s20 + $0xaa0] ss:$12 sps:$4 sm:$0xff]   ;;  %v6650_v55 = vld [vmem:[%s7175_s20 + $0xe70] ss:$12 sps:$4 sm:$0xff]  }
 0x1e8   : > { %4347 = vmatprep.subr.bf16.mxu0 %v6585_v54  ;;  %v6653_v54 = vld [vmem:[%s7175_s20 + $0xb78] ss:$12 sps:$4 sm:$0xff]  }
 0x1ea   : > { %5793 = vmatpush3.bf16.msra.mxu1 %v6587_v57  ;;  %v6658_v57 = vld [vmem:[%s7175_s20 + $0xb90] ss:$12 sps:$4 sm:$0xff]  }
 0x1eb   : > { %4348 = vmatpush1.bf16.msra.mxu0 %v6583_v40  ;;  %5794 = vmatprep.subr.bf16.mxu1 %v6591_v59  ;;  %v6654_v40 = vld [vmem:[%s7175_s20 + $0xab8] ss:$12 sps:$4 sm:$0xff]   ;;  %v6659_v59 = vld [vmem:[%s7175_s20 + $0xad0] ss:$12 sps:$4 sm:$0xff]  }
 0x1ec   : > { %4349 = vmatprep.subr.bf16.mxu0 %v6590_v58  ;;  %v6655_v58 = vld [vmem:[%s7175_s20 + $0xe88] ss:$12 sps:$4 sm:$0xff]  }
 0x1ee   : > { %5795 = vmatpush3.bf16.msra.mxu1 %v6592_v16  ;;  %v6660_v16 = vld [vmem:[%s7175_s20 + $0xea0] ss:$12 sps:$4 sm:$0xff]  }
 0x1ef   : > { %4350 = vmatpush1.bf16.msra.mxu0 %v6588_v60  ;;  %5796 = vmatprep.subr.bf16.mxu1 %v6596_v25  ;;  %v6663_v60 = vld [vmem:[%s7175_s20 + $0xba8] ss:$12 sps:$4 sm:$0xff]  }
 0x1f0   : > { %4351 = vmatprep.subr.bf16.mxu0 %v6595_v61  ;;  %v6664_v61 = vld [vmem:[%s7175_s20 + $0xae8] ss:$12 sps:$4 sm:$0xff]  }
 0x1f1   : > { %v6667_v25 = vld [vmem:[%s7175_s20 + $0xebc] ss:$12 sps:$4 sm:$0xff]  }
 0x1f2   : > { %5797 = vmatpush3.bf16.msra.mxu1 %v6597_v52  ;;  %v6665_v52 = vld [vmem:[%s7175_s20 + $0xeb8] ss:$12 sps:$4 sm:$0xff]  }
 0x1f3   : > { %4352 = vmatpush1.bf16.msra.mxu0 %v6593_v0  ;;  %5804 = vmatprep.subr.bf16.mxu1 %v6603_v3  ;;  %v6668_v0 = vld [vmem:[%s7175_s20 + $0xbc0] ss:$12 sps:$4 sm:$0xff]  }
 0x1f4   : > { %4362 = vmatprep.subr.bf16.mxu0 %v6602_v2  ;;  %v6669_v2 = vld [vmem:[%s7175_s20 + $0xb00] ss:$12 sps:$4 sm:$0xff]  }
 0x1f5   : > { %4718 = vmatmul.mubr.bf16.vlgmr.msra.gmra.mrb[24].mxu1 %v7432_v37  ;;  %v6610_v37 = vld [vmem:[%s7175_s20 + $0xdb0] ss:$12 sps:$4 sm:$0xff]   ;;  %v6672_v3 = vld [vmem:[%s7175_s20 + $0xed4] ss:$12 sps:$4 sm:$0xff]  }
 0x1f6   : > { %4354 = vmatmul.mubr.bf16.vlgmr.msra.gmra.mrb[0].mxu0 %v7673_v7  ;;  %5805 = vmatpush3.bf16.msra.mxu1 %v6604_v5 }
 0x1f7   : > { %4363 = vmatpush1.bf16.msra.mxu0 %v6600_v4  ;;  %5806 = vmatprep.subr.bf16.mxu1 %v6608_v10  ;;  %v6673_v4 = vld [vmem:[%s7175_s20 + $0xbd8] ss:$12 sps:$4 sm:$0xff]   ;;  %v6670_v10 = vld [vmem:[%s7175_s20 + $0xed0] ss:$12 sps:$4 sm:$0xff]  }
 0x1f8   : > { %4364 = vmatprep.subr.bf16.mxu0 %v6607_v9  ;;  %4757 = vmatprep.mubr.bf16.mxu1 %v7442_v22  ;;  %v6622_v22 = vld [vmem:[%s7175_s20 + $0xde4] ss:$12 sps:$4 sm:$0xff]  }
 0x1f9   : > { %4394 = vmatprep.mubr.bf16.mxu0 %v7681_v38 }
 0x1fa   : > { %5807 = vmatpush3.bf16.msra.mxu1 %v6609_v11 }
 0x1fb   : > { %4365 = vmatpush1.bf16.msra.mxu0 %v6605_v63  ;;  %5808 = vmatprep.subr.bf16.mxu1 %v6613_v13  ;;  %v6674_v63 = vld [vmem:[%s7175_s20 + $0xb18] ss:$12 sps:$4 sm:$0xff]  }
 0x1fc   : > { %4366 = vmatprep.subr.bf16.mxu0 %v6612_v12  ;;  %v6677_v13 = vld [vmem:[%s7175_s20 + $0xeec] ss:$12 sps:$4 sm:$0xff]  }
 0x1fe   : > { %5809 = vmatpush3.bf16.msra.mxu1 %v6614_v14 }
 0x1ff   : > { %4367 = vmatpush1.bf16.msra.mxu0 %v6610_v37  ;;  %5810 = vmatprep.subr.bf16.mxu1 %v6618_v17  ;;  %v6678_v37 = vld [vmem:[%s7175_s20 + $0xbf0] ss:$12 sps:$4 sm:$0xff]  }
 0x200   : > { %4368 = vmatprep.subr.bf16.mxu0 %v6617_v15  ;;  %v6675_v15 = vld [vmem:[%s7175_s20 + $0xee8] ss:$12 sps:$4 sm:$0xff]   ;;  %v6679_v17 = vld [vmem:[%s7175_s20 + $0xb30] ss:$12 sps:$4 sm:$0xff]  }
 0x202   : > { %5811 = vmatpush3.bf16.msra.mxu1 %v6619_v20  ;;  %v6685_v20 = vld [vmem:[%s7175_s20 + $0xcc8] ss:$12 sps:$4 sm:$0xff]  }
 0x203   : > { %4369 = vmatpush1.bf16.msra.mxu0 %v6615_v19  ;;  %5812 = vmatprep.subr.bf16.mxu1 %v6623_v6  ;;  %v6684_v19 = vld [vmem:[%s7175_s20 + $0xf04] ss:$12 sps:$4 sm:$0xff]  }
 0x204   : > { %4370 = vmatprep.subr.bf16.mxu0 %v6622_v22  ;;  %v7757_v22 = vcombine.low %v7675_v8, %v7675_v8  ;;  %v7759_v6 = vld [vmem:[#allocation2 + $0x50] sm:$0xff] }
 0x205   : > { %v6687_v8 = vld [vmem:[%s7175_s20 + $0xf18] ss:$12 sps:$4 sm:$0xff]  }
 0x206   : > { %5813 = vmatpush3.bf16.msra.mxu1 %v6624_v24  ;;  %v6686_v24 = vld [vmem:[%s7175_s20 + $0xc08] ss:$12 sps:$4 sm:$0xff]  }
 0x207   : > { %4371 = vmatpush1.bf16.msra.mxu0 %v6620_v21  ;;  %5814 = vmatprep.subr.bf16.mxu1 %v6628_v35  ;;  %v6682_v21 = vld [vmem:[%s7175_s20 + $0xf00] ss:$12 sps:$4 sm:$0xff]  }
 0x208   : > { %4372 = vmatprep.subr.bf16.mxu0 %v6627_v27  ;;  %v7707_v32 = vpop.f32.mrb[0].mxu1  ;;  %v6689_v27 = vld [vmem:[%s7175_s20 + $0xf1c] ss:$12 sps:$4 sm:$0xff]   ;;  %v6690_v35 = vld [vmem:[%s7175_s20 + $0xce0] ss:$12 sps:$4 sm:$0xff]  }
 0x209   : > { %v7711_v34 = vpop.f32.mrb[1].mxu1 }
 0x20a   : > { %v4113_v39 = vpop.f32.mrb[2].mxu1  ;;  %5815 = vmatpush3.bf16.msra.mxu1 %v6629_v29  ;;  %v6691_v29 = vld [vmem:[%s7175_s20 + $0xc20] ss:$12 sps:$4 sm:$0xff]  }
 0x20b   : > { %4373 = vmatpush1.bf16.msra.mxu0 %v6625_v28  ;;  %v4114_v53 = vpop.f32.mrb[3].mxu1  ;;  %5816 = vmatprep.subr.bf16.mxu1 %v6633_v31  ;;  %v7767_v28 = vcombine.high %v7759_v6, %v7759_v6  ;;  %v6695_v31 = vld [vmem:[%s7175_s20 + $0xcf8] ss:$12 sps:$4 sm:$0xff]   ;;  %v6700_v39 = vld [vmem:[%s7175_s20 + $0xd10] ss:$12 sps:$4 sm:$0xff]  }
 0x20c   : > { %4374 = vmatprep.subr.bf16.mxu0 %v6632_v30  ;;  %v6694_v30 = vld [vmem:[%s7175_s20 + $0xf34] ss:$12 sps:$4 sm:$0xff]   ;;  %v6701_v53 = vld [vmem:[%s7175_s20 + $0xc50] ss:$12 sps:$4 sm:$0xff]  }
 0x20e   : > { %5817 = vmatpush3.bf16.msra.mxu1 %v6634_v36  ;;  %v6699_v36 = vld [vmem:[%s7175_s20 + $0xf4c] ss:$12 sps:$4 sm:$0xff]  }
 0x20f   : > { %4375 = vmatpush1.bf16.msra.mxu0 %v6630_v33  ;;  %5818 = vmatprep.subr.bf16.mxu1 %v6638_v42  ;;  %v6696_v33 = vld [vmem:[%s7175_s20 + $0xc38] ss:$12 sps:$4 sm:$0xff]  }
 0x210   : > { %4376 = vmatprep.subr.bf16.mxu0 %v6637_v41  ;;  %v982_v41 = vlaneseq  ;;  %v6704_v42 = vld [vmem:[%s7175_s20 + $0xf64] ss:$12 sps:$4 sm:$0xff]  }
 0x212   : > { %5819 = vmatpush3.bf16.msra.mxu1 %v6639_v23  ;;  %v7786_v23 = vshrl.u32 %v982_v41, 7  ;;  %v6752_v41 = vld [vmem:[%s7175_s20 + $0x1050] ss:$12 sps:$4 sm:$0xff]  }
 0x213   : > { %4377 = vmatpush1.bf16.msra.mxu0 %v6635_v43  ;;  %5826 = vmatprep.subr.bf16.mxu1 %v6643_v18  ;;  %v6705_v43 = vld [vmem:[%s7175_s20 + $0xd28] ss:$12 sps:$4 sm:$0xff]   ;;  %v6702_v18 = vld [vmem:[%s7175_s20 + $0xf60] ss:$12 sps:$4 sm:$0xff]  }
 0x214   : > { %4378 = vmatprep.subr.bf16.mxu0 %v6642_v44  ;;  %v992_v44 = vsub.s32 2, %v7786_v23 }
 0x215   : > { %4758 = vmatmul.mubr.bf16.vlgmr.msra.gmra.mrb[28].mxu1 %v7513_v48  ;;  %v6657_v48 = vld [vmem:[%s7175_s20 + $0xe8c] ss:$12 sps:$4 sm:$0xff]  }
 0x216   : > { %5827 = vmatpush3.bf16.msra.mxu1 %v6644_v46  ;;  %4797 = vmatprep.mubr.bf16.mxu1 %v7521_v56  ;;  %v6662_v56 = vld [vmem:[%s7175_s20 + $0xea4] ss:$12 sps:$4 sm:$0xff]   ;;  %v6709_v46 = vld [vmem:[%s7175_s20 + $0xf7c] ss:$12 sps:$4 sm:$0xff]  }
 0x217   : > { %4379 = vmatpush1.bf16.msra.mxu0 %v6640_v45  ;;  %5828 = vmatprep.subr.bf16.mxu1 %v6648_v26  ;;  %v6706_v45 = vld [vmem:[%s7175_s20 + $0xc68] ss:$12 sps:$4 sm:$0xff]  }
 0x218   : > { %4380 = vmatprep.subr.bf16.mxu0 %v6647_v47  ;;  %v6710_v47 = vld [vmem:[%s7175_s20 + $0xd40] ss:$12 sps:$4 sm:$0xff]  }
 0x219   : > { %v7793_v26 = vld [vmem:[%s209_s26] sm:$0x7] }
 0x21a   : > { %5829 = vmatpush3.bf16.msra.mxu1 %v6649_v50  ;;  %v6707_v50 = vld [vmem:[%s7175_s20 + $0xf78] ss:$12 sps:$4 sm:$0xff]  }
 0x21b   : > { %4381 = vmatpush1.bf16.msra.mxu0 %v6645_v49  ;;  %5830 = vmatprep.subr.bf16.mxu1 %v6653_v54  ;;  %v993_v49 = vrot.slane %v7793_v26, %v992_v44  ;;  %v6714_v54 = vld [vmem:[%s7175_s20 + $0xf94] ss:$12 sps:$4 sm:$0xff]  }
 0x21c   : > { %4382 = vmatprep.subr.bf16.mxu0 %v6652_v51  ;;  %v6711_v51 = vld [vmem:[%s7175_s20 + $0xc80] ss:$12 sps:$4 sm:$0xff]  }
 0x21e   : > { %5831 = vmatpush3.bf16.msra.mxu1 %v6654_v40 }
 0x21f   : > { %4383 = vmatpush1.bf16.msra.mxu0 %v6650_v55  ;;  %5832 = vmatprep.subr.bf16.mxu1 %v6658_v57  ;;  %v6715_v55 = vld [vmem:[%s7175_s20 + $0xd58] ss:$12 sps:$4 sm:$0xff]  }
 0x220   : > { %4384 = vmatprep.subr.bf16.mxu0 %v6657_v48 }
 0x222   : > { %5833 = vmatpush3.bf16.msra.mxu1 %v6659_v59  ;;  %v6712_v59 = vld [vmem:[%s7175_s20 + $0xf90] ss:$12 sps:$4 sm:$0xff]  }
 0x223   : > { %4385 = vmatpush1.bf16.msra.mxu0 %v6655_v58  ;;  %5834 = vmatprep.subr.bf16.mxu1 %v6663_v60 }
 0x224   : > { %4386 = vmatprep.subr.bf16.mxu0 %v6662_v56  ;;  %v6716_v56 = vld [vmem:[%s7175_s20 + $0xc98] ss:$12 sps:$4 sm:$0xff]  }
 0x226   : > { %5835 = vmatpush3.bf16.msra.mxu1 %v6664_v61  ;;  %v6720_v61 = vld [vmem:[%s7175_s20 + $0xd70] ss:$12 sps:$4 sm:$0xff]  }
 0x227   : > { %4387 = vmatpush1.bf16.msra.mxu0 %v6660_v16  ;;  %5836 = vmatprep.subr.bf16.mxu1 %v6668_v0  ;;  %v6719_v16 = vld [vmem:[%s7175_s20 + $0xfac] ss:$12 sps:$4 sm:$0xff]  }
 0x228   : > { %4388 = vmatprep.subr.bf16.mxu0 %v6667_v25  ;;  %v5688_v5 = vpop.f32.mrb[4].mxu1 }
 0x229   : > { %v5689_v9 = vpop.f32.mrb[5].mxu1 }
 0x22a   : > { %5837 = vmatpush3.bf16.msra.mxu1 %v6669_v2  ;;  %v7747_v11 = vadd.f32 %v5689_v9, %v5688_v5  ;;  %v5691_v12 = vpop.f32.mrb[6].mxu1  ;;  %v6721_v2 = vld [vmem:[%s7175_s20 + $0xcb0] ss:$12 sps:$4 sm:$0xff]   ;;  %v6722_v5 = vld [vmem:[%s7175_s20 + $0xfc0] ss:$12 sps:$4 sm:$0xff]  }
 0x22b   : > { %4389 = vmatpush1.bf16.msra.mxu0 %v6665_v52  ;;  %5838 = vmatprep.subr.bf16.mxu1 %v6673_v4  ;;  %v5692_v14 = vpop.f32.mrb[7].mxu1  ;;  %v6717_v52 = vld [vmem:[%s7175_s20 + $0xfa8] ss:$12 sps:$4 sm:$0xff]   ;;  %v6731_v12 = vld [vmem:[%s7175_s20 + $0xda0] ss:$12 sps:$4 sm:$0xff]  }
 0x22c   : > { %4390 = vmatprep.subr.bf16.mxu0 %v6672_v3  ;;  %v4520_v57 = vadd.f32 %v7747_v11, %v993_v49  ;;  %v6724_v3 = vld [vmem:[%s7175_s20 + $0xfc4] ss:$12 sps:$4 sm:$0xff]   ;;  %v6725_v4 = vld [vmem:[%s7175_s20 + $0xe48] ss:$12 sps:$4 sm:$0xff]  }
 0x22d   : > { %v6726_v9 = vld [vmem:[%s7175_s20 + $0xd88] ss:$12 sps:$4 sm:$0xff]   ;;  %v6727_v11 = vld [vmem:[%s7175_s20 + $0xfd8] ss:$12 sps:$4 sm:$0xff]   ;;  %v6732_v14 = vld [vmem:[%s7175_s20 + $0xff0] ss:$12 sps:$4 sm:$0xff]  }
 0x22e   : > { %5839 = vmatpush3.bf16.msra.mxu1 %v6674_v63  ;;  %v6730_v63 = vld [vmem:[%s7175_s20 + $0xe60] ss:$12 sps:$4 sm:$0xff]   ;;  %v6767_v49 = vld [vmem:[%s7175_s20 + $0xfc8] ss:$12 sps:$4 sm:$0xff]  }
 0x22f   : > { %4391 = vmatpush1.bf16.msra.mxu0 %v6670_v10  ;;  %5840 = vmatprep.subr.bf16.mxu1 %v6678_v37  ;;  %v6729_v10 = vld [vmem:[%s7175_s20 + $0xfdc] ss:$12 sps:$4 sm:$0xff]   ;;  %v6735_v37 = vld [vmem:[%s7175_s20 + $0xe78] ss:$12 sps:$4 sm:$0xff]  }
 0x230   : > { %4392 = vmatprep.subr.bf16.mxu0 %v6677_v13  ;;  %v6734_v13 = vld [vmem:[%s7175_s20 + $0xff4] ss:$12 sps:$4 sm:$0xff]  }
 0x232   : > { %5841 = vmatpush3.bf16.msra.mxu1 %v6679_v17  ;;  %v6740_v17 = vld [vmem:[%s7175_s20 + $0xe90] ss:$12 sps:$4 sm:$0xff]  }
 0x233   : > { %4393 = vmatpush1.bf16.msra.mxu0 %v6675_v15  ;;  %5848 = vmatprep.subr.bf16.mxu1 %v6685_v20  ;;  %v6739_v15 = vld [vmem:[%s7175_s20 + $0x100c] ss:$12 sps:$4 sm:$0xff]   ;;  %v6741_v20 = vld [vmem:[%s7175_s20 + $0xdd0] ss:$12 sps:$4 sm:$0xff]  }
 0x234   : > { %4403 = vmatprep.subr.bf16.mxu0 %v6684_v19  ;;  %v6737_v19 = vld [vmem:[%s7175_s20 + $0x1008] ss:$12 sps:$4 sm:$0xff]  }
 0x235   : > { %4798 = vmatmul.mubr.bf16.vlgmr.msra.gmra.mrb[32].mxu1 %v7593_v62  ;;  %v6692_v62 = vld [vmem:[%s7175_s20 + $0xf30] ss:$12 sps:$4 sm:$0xff]  }
 0x236   : > { %4395 = vmatmul.mubr.bf16.vlgmr.msra.gmra.mrb[0].mxu0 %v7757_v22  ;;  %5849 = vmatpush3.bf16.msra.mxu1 %v6686_v24  ;;  %v6742_v24 = vld [vmem:[%s7175_s20 + $0x1020] ss:$12 sps:$4 sm:$0xff]  }
 0x237   : > { %4404 = vmatpush1.bf16.msra.mxu0 %v6682_v21  ;;  %5850 = vmatprep.subr.bf16.mxu1 %v6690_v35  ;;  %v6745_v21 = vld [vmem:[%s7175_s20 + $0xea8] ss:$12 sps:$4 sm:$0xff]  }
 0x238   : > { %4405 = vmatprep.subr.bf16.mxu0 %v6689_v27  ;;  %4837 = vmatprep.mubr.bf16.mxu1 %v7601_v1  ;;  %v6697_v1 = vld [vmem:[%s7175_s20 + $0xf48] ss:$12 sps:$4 sm:$0xff]  }
 0x239   : > { %4435 = vmatprep.mubr.bf16.mxu0 %v7767_v28  ;;  %v6746_v27 = vld [vmem:[%s7175_s20 + $0xde8] ss:$12 sps:$4 sm:$0xff]  }
 0x23a   : > { %5851 = vmatpush3.bf16.msra.mxu1 %v6691_v29  ;;  %v6749_v35 = vld [vmem:[%s7175_s20 + $0x103c] ss:$12 sps:$4 sm:$0xff]   ;;  %v6747_v29 = vld [vmem:[%s7175_s20 + $0x1038] ss:$12 sps:$4 sm:$0xff]  }
 0x23b   : > { %4406 = vmatpush1.bf16.msra.mxu0 %v6687_v8  ;;  %5852 = vmatprep.subr.bf16.mxu1 %v6695_v31  ;;  %v6750_v8 = vld [vmem:[%s7175_s20 + $0xec0] ss:$12 sps:$4 sm:$0xff]  }
 0x23c   : > { %4407 = vmatprep.subr.bf16.mxu0 %v6694_v30  ;;  %v6751_v30 = vld [vmem:[%s7175_s20 + $0xe00] ss:$12 sps:$4 sm:$0xff]  }
 0x23d   : > { %v6754_v31 = vld [vmem:[%s7175_s20 + $0x1054] ss:$12 sps:$4 sm:$0xff]  }
 0x23e   : > { %5853 = vmatpush3.bf16.msra.mxu1 %v6696_v33 }
 0x23f   : > { %4408 = vmatpush1.bf16.msra.mxu0 %v6692_v62  ;;  %5854 = vmatprep.subr.bf16.mxu1 %v6700_v39  ;;  %v6755_v62 = vld [vmem:[%s7175_s20 + $0xed8] ss:$12 sps:$4 sm:$0xff]  }
 0x240   : > { %4409 = vmatprep.subr.bf16.mxu0 %v6699_v36 }
 0x242   : > { %5855 = vmatpush3.bf16.msra.mxu1 %v6701_v53 }
 0x243   : > { %4410 = vmatpush1.bf16.msra.mxu0 %v6697_v1  ;;  %5856 = vmatprep.subr.bf16.mxu1 %v6705_v43  ;;  %v6756_v1 = vld [vmem:[%s7175_s20 + $0xe18] ss:$12 sps:$4 sm:$0xff]   ;;  %v6760_v43 = vld [vmem:[%s7175_s20 + $0xef0] ss:$12 sps:$4 sm:$0xff]  }
 0x244   : > { %4411 = vmatprep.subr.bf16.mxu0 %v6704_v42  ;;  %v6759_v42 = vld [vmem:[%s7175_s20 + $0x106c] ss:$12 sps:$4 sm:$0xff]  }
 0x246   : > { %5857 = vmatpush3.bf16.msra.mxu1 %v6706_v45  ;;  %v6757_v45 = vld [vmem:[%s7175_s20 + $0x1068] ss:$12 sps:$4 sm:$0xff]  }
 0x247   : > { %4412 = vmatpush1.bf16.msra.mxu0 %v6702_v18  ;;  %5858 = vmatprep.subr.bf16.mxu1 %v6710_v47  ;;  %v6766_v47 = vld [vmem:[%s7175_s20 + $0x1084] ss:$12 sps:$4 sm:$0xff]  }
 0x248   : > { %4413 = vmatprep.subr.bf16.mxu0 %v6709_v46  ;;  %v5710_v40 = vpop.f32.mrb[8].mxu1  ;;  %v6761_v46 = vld [vmem:[%s7175_s20 + $0xe30] ss:$12 sps:$4 sm:$0xff]  }
 0x249   : > { %v5711_v48 = vpop.f32.mrb[9].mxu1 }
 0x24a   : > { %v5712_v58 = vadd.f32 %v5711_v48, %v5710_v40  ;;  %5859 = vmatpush3.bf16.msra.mxu1 %v6711_v51  ;;  %v5713_v60 = vpop.f32.mrb[10].mxu1  ;;  %v6764_v51 = vld [vmem:[%s7175_s20 + $0x1080] ss:$12 sps:$4 sm:$0xff]  }
 0x24b   : > { %4414 = vmatpush1.bf16.msra.mxu0 %v6707_v50  ;;  %5860 = vmatprep.subr.bf16.mxu1 %v6715_v55  ;;  %v5714_v25 = vpop.f32.mrb[11].mxu1  ;;  %v7850_v50 = vcombine.low %v7759_v6, %v7759_v6  ;;  %v6771_v55 = vld [vmem:[%s7175_s20 + $0x109c] ss:$12 sps:$4 sm:$0xff]   ;;  %v6772_v40 = vld [vmem:[%s7175_s20 + $0xfe0] ss:$12 sps:$4 sm:$0xff]  }
 0x24c   : > { %4415 = vmatprep.subr.bf16.mxu0 %v6714_v54  ;;  %v7805_v0 = vadd.f32 %v5712_v58, %v4520_v57  ;;  %v6768_v54 = vld [vmem:[%s7175_s20 + $0xf08] ss:$12 sps:$4 sm:$0xff]   ;;  %v6769_v6 = vld [vmem:[%s7175_s20 + $0x1098] ss:$12 sps:$4 sm:$0xff]   ;;  %v6773_v48 = vld [vmem:[%s7175_s20 + $0xf20] ss:$12 sps:$4 sm:$0xff]  }
 0x24d   : > { %v6776_v57 = vld [vmem:[%s7175_s20 + $0x10b4] ss:$12 sps:$4 sm:$0xff]   ;;  %v6777_v58 = vld [vmem:[%s7175_s20 + $0xff8] ss:$12 sps:$4 sm:$0xff]   ;;  %v6783_v25 = vld [vmem:[%s7175_s20 + $0xf50] ss:$12 sps:$4 sm:$0xff]  }
 0x24e   : > { %5861 = vmatpush3.bf16.msra.mxu1 %v6716_v56  ;;  %v6778_v56 = vld [vmem:[%s7175_s20 + $0xf38] ss:$12 sps:$4 sm:$0xff]  }
 0x24f   : > { %4416 = vmatpush1.bf16.msra.mxu0 %v6712_v59  ;;  %5862 = vmatprep.subr.bf16.mxu1 %v6720_v61  ;;  %v6970_v59 = vmov 0   ;;  %v6781_v60 = vld [vmem:[%s7175_s20 + $0x10cc] ss:$12 sps:$4 sm:$0xff]   ;;  %v6779_v61 = vld [vmem:[%s7175_s20 + $0x10c8] ss:$12 sps:$4 sm:$0xff]  }
 0x250   : > { %4417 = vmatprep.subr.bf16.mxu0 %v6719_v16  ;;  %v6782_v16 = vld [vmem:[%s7175_s20 + $0x1010] ss:$12 sps:$4 sm:$0xff]  }
 0x252   : > { %5863 = vmatpush3.bf16.msra.mxu1 %v6721_v2  ;;  %v6788_v2 = vld [vmem:[%s7175_s20 + $0xf68] ss:$12 sps:$4 sm:$0xff]  }
 0x253   : > { %4418 = vmatpush1.bf16.msra.mxu0 %v6717_v52  ;;  %5870 = vmatprep.subr.bf16.mxu1 %v6725_v4  ;;  %v6784_v52 = vld [vmem:[%s7175_s20 + $0x10e0] ss:$12 sps:$4 sm:$0xff]  }
 0x254   : > { %4419 = vmatprep.subr.bf16.mxu0 %v6724_v3  ;;  %v6791_v3 = vld [vmem:[%s7175_s20 + $0x10fc] ss:$12 sps:$4 sm:$0xff]   ;;  %v6792_v4 = vld [vmem:[%s7175_s20 + $0x1040] ss:$12 sps:$4 sm:$0xff]  }
 0x255   : > { %4838 = vmatmul.mubr.bf16.vlgmr.msra.gmra.mrb[36].mxu1 %v7673_v7  ;;  %v6736_v7 = vld [vmem:[%s7175_s20 + $0xdb8] ss:$12 sps:$4 sm:$0xff]  }
 0x256   : > { %5871 = vmatpush3.bf16.msra.mxu1 %v6726_v9  ;;  %4877 = vmatprep.mubr.bf16.mxu1 %v7681_v38  ;;  %v6744_v38 = vld [vmem:[%s7175_s20 + $0x1024] ss:$12 sps:$4 sm:$0xff]   ;;  %v6793_v9 = vld [vmem:[%s7175_s20 + $0xf80] ss:$12 sps:$4 sm:$0xff]  }
 0x257   : > { %4420 = vmatpush1.bf16.msra.mxu0 %v6722_v5  ;;  %5872 = vmatprep.subr.bf16.mxu1 %v6730_v63  ;;  %v6789_v5 = vld [vmem:[%s7175_s20 + $0x10f8] ss:$12 sps:$4 sm:$0xff]  }
 0x258   : > { %4421 = vmatprep.subr.bf16.mxu0 %v6729_v10  ;;  %v6795_v10 = vld [vmem:[%s7175_s20 + $0x1058] ss:$12 sps:$4 sm:$0xff]  }
 0x25a   : > { %5873 = vmatpush3.bf16.msra.mxu1 %v6731_v12  ;;  %v6794_v12 = vld [vmem:[#allocation2 + $0x58] ss:$0 sps:$4 sm:$0xff]  }
 0x25b   : > { %4422 = vmatpush1.bf16.msra.mxu0 %v6727_v11  ;;  %5874 = vmatprep.subr.bf16.mxu1 %v6735_v37  ;;  %v6796_v37 = vld [vmem:[%s7175_s20 + $0xf98] ss:$12 sps:$4 sm:$0xff]  }
 0x25c   : > { %4423 = vmatprep.subr.bf16.mxu0 %v6734_v13 }
 0x25e   : > { %5875 = vmatpush3.bf16.msra.mxu1 %v6736_v7 }
 0x25f   : > { %4424 = vmatpush1.bf16.msra.mxu0 %v6732_v14  ;;  %5876 = vmatprep.subr.bf16.mxu1 %v6740_v17  ;;  %v6797_v14 = vld [vmem:[%s7175_s20 + $0x1088] ss:$12 sps:$4 sm:$0xff]   ;;  %v6798_v17 = vld [vmem:[%s7175_s20 + $0x1070] ss:$12 sps:$4 sm:$0xff]  }
 0x260   : > { %4425 = vmatprep.subr.bf16.mxu0 %v6739_v15  ;;  %v6971_v15 = vmov 0.0  }
 0x262   : > { %5877 = vmatpush3.bf16.msra.mxu1 %v6741_v20 }
 0x263   : > { %4426 = vmatpush1.bf16.msra.mxu0 %v6737_v19  ;;  %5878 = vmatprep.subr.bf16.mxu1 %v6745_v21  ;;  %v6800_v21 = vld [vmem:[%s7175_s20 + $0x10a0] ss:$12 sps:$4 sm:$0xff]  }
 0x264   : > { %4427 = vmatprep.subr.bf16.mxu0 %v6744_v38  ;;  %v6799_v38 = vld [vmem:[%s7175_s20 + $0xfb0] ss:$12 sps:$4 sm:$0xff]  }
 0x266   : > { %5879 = vmatpush3.bf16.msra.mxu1 %v6746_v27  ;;  %v6802_v27 = vld [vmem:[%s7175_s20 + $0x10d0] ss:$12 sps:$4 sm:$0xff]  }
 0x267   : > { %4428 = vmatpush1.bf16.msra.mxu0 %v6742_v24  ;;  %5880 = vmatprep.subr.bf16.mxu1 %v6750_v8  ;;  %v6801_v24 = vld [vmem:[%s7175_s20 + $0x10b8] ss:$12 sps:$4 sm:$0xff]   ;;  %v6804_v8 = vld [vmem:[%s7175_s20 + $0x1100] ss:$12 sps:$4 sm:$0xff]  }
 0x268   : > { %4429 = vmatprep.subr.bf16.mxu0 %v6749_v35  ;;  %v5732_v33 = vpop.f32.mrb[12].mxu1  ;;  %v6803_v35 = vld [vmem:[%s7175_s20 + $0x10e8] ss:$12 sps:$4 sm:$0xff]  }
 0x269   : > { %v5733_v36 = vpop.f32.mrb[13].mxu1 }
 0x26a   : > { %v5734_v39 = vadd.f32 %v5733_v36, %v5732_v33  ;;  %5881 = vmatpush3.bf16.msra.mxu1 %v6751_v30  ;;  %v5735_v53 = vpop.f32.mrb[14].mxu1 }
 0x26b   : > { %4430 = vmatpush1.bf16.msra.mxu0 %v6747_v29  ;;  %5882 = vmatprep.subr.bf16.mxu1 %v6755_v62  ;;  %v5736_v44 = vpop.f32.mrb[15].mxu1 }
 0x26c   : > { %4431 = vmatprep.subr.bf16.mxu0 %v6754_v31  ;;  %v7842_v18 = vadd.f32 %v5734_v39, %v7805_v0  ;;  %v6787_v0 = vld [vmem:[%s7175_s20 + $0x1028] ss:$12 sps:$4 sm:$0xff]  }
 0x26e   : > { %5883 = vmatpush3.bf16.msra.mxu1 %v6756_v1 }
 0x26f   : > { %4432 = vmatpush1.bf16.msra.mxu0 %v6752_v41  ;;  %5884 = vmatprep.subr.bf16.mxu1 %v6760_v43 }
 0x270   : > { %4433 = vmatprep.subr.bf16.mxu0 %v6759_v42 }
 0x272   : > { %5885 = vmatpush3.bf16.msra.mxu1 %v6761_v46 }
 0x273   : > { %4434 = vmatpush1.bf16.msra.mxu0 %v6757_v45  ;;  %5892 = vmatprep.subr.bf16.mxu1 %v6767_v49 }
 0x274   : > { %4444 = vmatprep.subr.bf16.mxu0 %v6766_v47 }
 0x275   : > { %4878 = vmatmul.mubr.bf16.vlgmr.msra.gmra.mrb[40].mxu1 %v7757_v22  ;;  %v6774_v22 = vld [vmem:[%s7175_s20 + $0x10b0] ss:$12 sps:$4 sm:$0xff]  }
 0x276   : > { %4436 = vmatmul.mubr.bf16.vlgmr.msra.gmra.mrb[0].mxu0 %v7850_v50  ;;  %5893 = vmatpush3.bf16.msra.mxu1 %v6768_v54 }
 0x277   : > { %4445 = vmatpush1.bf16.msra.mxu0 %v6764_v51  ;;  %5894 = vmatprep.subr.bf16.mxu1 %v6772_v40 }
 0x278   : > { %4446 = vmatprep.subr.bf16.mxu0 %v6771_v55  ;;  %4476 = vmatprep.mubr.bf16.mxu0 %v6970_v59 }
 0x279   : > { %4917 = vmatprep.mubr.bf16.mxu1 %v7767_v28  ;;  %v6786_v28 = vld [vmem:[%s7175_s20 + $0x10e4] ss:$12 sps:$4 sm:$0xff]  }
 0x27a   : > { %5895 = vmatpush3.bf16.msra.mxu1 %v6773_v48 }
 0x27b   : > { %4447 = vmatpush1.bf16.msra.mxu0 %v6769_v6  ;;  %5896 = vmatprep.subr.bf16.mxu1 %v6777_v58 }
 0x27c   : > { %4448 = vmatprep.subr.bf16.mxu0 %v6776_v57 }
 0x27e   : > { %5897 = vmatpush3.bf16.msra.mxu1 %v6778_v56 }
 0x27f   : > { %4449 = vmatpush1.bf16.msra.mxu0 %v6774_v22  ;;  %5898 = vmatprep.subr.bf16.mxu1 %v6782_v16 }
 0x280   : > { %4450 = vmatprep.subr.bf16.mxu0 %v6781_v60 }
 0x282   : > { %5899 = vmatpush3.bf16.msra.mxu1 %v6783_v25 }
 0x283   : > { %4451 = vmatpush1.bf16.msra.mxu0 %v6779_v61  ;;  %5900 = vmatprep.subr.bf16.mxu1 %v6787_v0 }
 0x284   : > { %4452 = vmatprep.subr.bf16.mxu0 %v6786_v28 }
 0x286   : > { %5901 = vmatpush3.bf16.msra.mxu1 %v6788_v2  ;;  %v988_v2 = vsub.s32 1, %v7786_v23 }
 0x287   : > { %4453 = vmatpush1.bf16.msra.mxu0 %v6784_v52  ;;  %5902 = vmatprep.subr.bf16.mxu1 %v6792_v4  ;;  %v984_v52 = vsub.s32 0, %v7786_v23 }
 0x288   : > { %4454 = vmatprep.subr.bf16.mxu0 %v6791_v3  ;;  %v5754_v63 = vpop.f32.mrb[16].mxu1  ;;  %v989_v4 = vrot.slane %v7793_v26, %v988_v2 }
 0x289   : > { %v5755_v11 = vpop.f32.mrb[17].mxu1  ;;  %v985_v3 = vrot.slane %v7793_v26, %v984_v52 }
 0x28a   : > { %v5756_v13 = vadd.f32 %v5755_v11, %v5754_v63  ;;  %5903 = vmatpush3.bf16.msra.mxu1 %v6793_v9  ;;  %v5757_v7 = vpop.f32.mrb[18].mxu1  ;;  %v5939_v9 = vadd.f32 %v7711_v34, %v989_v4 }
 0x28b   : > { %4455 = vmatpush1.bf16.msra.mxu0 %v6789_v5  ;;  %5904 = vmatprep.subr.bf16.mxu1 %v6795_v10  ;;  %v5758_v19 = vpop.f32.mrb[19].mxu1  ;;  %v5937_v5 = vadd.f32 %v7707_v32, %v985_v3 }
 0x28c   : > { %5921 = vmatprep.subr.bf16.mxu0 %v6971_v15  ;;  %v4640_v20 = vadd.f32 %v5756_v13, %v7842_v18 }
 0x28e   : > { %5665 = vmatmul.mubr.msk.bf16.vlgmr.msra.gmra.mrb[0].mxu0 %vm3989_vm0, %v6794_v12  ;;  %5905 = vmatpush3.bf16.msra.mxu1 %v6796_v37 }
 0x28f   : > { %5922 = vmatpush3.bf16.msra.mxu0 %v6797_v14  ;;  %5906 = vmatprep.subr.bf16.mxu1 %v6798_v17 }
 0x290   : > { %5923 = vmatprep.subr.bf16.mxu0 %v6971_v15  ;;  %5933 = vmatprep.mubr.msk.bf16.mxu0 %vm6972_vm1, %v6971_v15 }
 0x292   : > { %5907 = vmatpush3.bf16.msra.mxu1 %v6799_v38 }
 0x293   : > { %5924 = vmatpush3.bf16.msra.mxu0 %v6800_v21 }
 0x294   : > { %5925 = vmatprep.subr.bf16.mxu0 %v6971_v15 }
 0x295   : > { %4918 = vmatmul.mubr.bf16.vlgmr.msra.gmra.mrb[44].mxu1 %v7850_v50 }
 0x297   : > { %5926 = vmatpush3.bf16.msra.mxu0 %v6801_v24 }
 0x298   : > { %5927 = vmatprep.subr.bf16.mxu0 %v6971_v15 }
 0x29b   : > { %5928 = vmatpush3.bf16.msra.mxu0 %v6802_v27 }
 0x29c   : > { %5929 = vmatprep.subr.bf16.mxu0 %v6971_v15 }
 0x29f   : > { %5930 = vmatpush3.bf16.msra.mxu0 %v6803_v35 }
 0x2a0   : > { %5931 = vmatprep.subr.bf16.mxu0 %v6971_v15 }
 0x2a3   : > { %5932 = vmatpush3.bf16.msra.mxu0 %v6804_v8 }
 0x2a6   : > { %5934 = vmatmul.mubr.msk.bf16.vlgmr.msra.gmra.mrb[4].mxu0 %vm3989_vm0, %v6794_v12 }
 0x2a8   : > { %v5776_v29 = vpop.f32.mrb[20].mxu1 }
 0x2a9   : > { %v5777_v30 = vpop.f32.mrb[21].mxu1 }
 0x2aa   : > { %v5778_v31 = vadd.f32 %v5777_v30, %v5776_v29  ;;  %v5779_v62 = vpop.f32.mrb[22].mxu1 }
 0x2ab   : > { %v5780_v33 = vpop.f32.mrb[23].mxu1 }
 0x2ac   : > { %v4680_v36 = vadd.f32 %v5778_v31, %v4640_v20 }
 0x2c8   : > { %v5798_v39 = vpop.f32.mrb[24].mxu1 }
 0x2c9   : > { %v5799_v41 = vpop.f32.mrb[25].mxu1 }
 0x2ca   : > { %v5800_v1 = vadd.f32 %v5799_v41, %v5798_v39  ;;  %v5801_v53 = vpop.f32.mrb[26].mxu1 }
 0x2cb   : > { %v5802_v42 = vpop.f32.mrb[27].mxu1 }
 0x2cc   : > { %v4720_v43 = vadd.f32 %v5800_v1, %v4680_v36 }
 0x2e8   : > { %v5820_v44 = vpop.f32.mrb[28].mxu1 }
 0x2e9   : > { %v5821_v18 = vpop.f32.mrb[29].mxu1 }
 0x2ea   : > { %v5822_v45 = vadd.f32 %v5821_v18, %v5820_v44  ;;  %v5823_v46 = vpop.f32.mrb[30].mxu1 }
 0x2eb   : > { %v5824_v47 = vpop.f32.mrb[31].mxu1 }
 0x2ec   : > { %v4760_v49 = vadd.f32 %v5822_v45, %v4720_v43 }
 0x308   : > { %v5842_v50 = vpop.f32.mrb[32].mxu1 }
 0x309   : > { %v5843_v51 = vpop.f32.mrb[33].mxu1 }
 0x30a   : > { %v5844_v54 = vadd.f32 %v5843_v51, %v5842_v50  ;;  %v5845_v55 = vpop.f32.mrb[34].mxu1 }
 0x30b   : > { %v5846_v40 = vpop.f32.mrb[35].mxu1 }
 0x30c   : > { %v4800_v6 = vadd.f32 %v5844_v54, %v4760_v49 }
 0x328   : > { %v5864_v48 = vpop.f32.mrb[36].mxu1 }
 0x329   : > { %v5865_v57 = vpop.f32.mrb[37].mxu1 }
 0x32a   : > { %v5866_v58 = vadd.f32 %v5865_v57, %v5864_v48  ;;  %v5867_v59 = vpop.f32.mrb[38].mxu1 }
 0x32b   : > { %v5868_v22 = vpop.f32.mrb[39].mxu1 }
 0x32c   : > { %v4840_v56 = vadd.f32 %v5866_v58, %v4800_v6 }
 0x348   : > { %v5886_v60 = vpop.f32.mrb[40].mxu1 }
 0x349   : > { %v5887_v16 = vpop.f32.mrb[41].mxu1 }
 0x34a   : > { %v5888_v61 = vadd.f32 %v5887_v16, %v5886_v60  ;;  %v5889_v25 = vpop.f32.mrb[42].mxu1 }
 0x34b   : > { %v5890_v28 = vpop.f32.mrb[43].mxu1 }
 0x34c   : > { %v4880_v0 = vadd.f32 %v5888_v61, %v4840_v56 }
 0x361   : > { %v4478_v10 = vpop.f32.mrb[0].mxu0 }
 0x362   : > { %v5938_v63 = vadd.f32 %v5937_v5, %v4478_v10  ;;  %v4480_v11 = vpop.f32.mrb[1].mxu0 }
 0x363   : > { %v5940_v12 = vadd.f32 %v5939_v9, %v4480_v11  ;;  %v4482_v13 = vpop.f32.mrb[2].mxu0 }
 0x364   : > { %v4965_v37 = vmax.f32 %v5938_v63, 0.0  ;;  %v4483_v14 = vpop.f32.mrb[3].mxu0 }
 0x365   : > { %v4966_v7 = vmax.f32 %v5940_v12, 0.0 }
 0x366   : > { %4968 = vst [vmem:[%s236_s9] sm:$0xff] %v4965_v37 }
 0x367   : > { %4969 = vst [vmem:[%s236_s9 + $0x8] sm:$0xff] %v4966_v7 }
 0x368   : > { %v5908_v23 = vpop.f32.mrb[44].mxu1 }
 0x369   : > { %v5909_v15 = vpop.f32.mrb[45].mxu1 }
 0x36a   : > { %v5910_v26 = vadd.f32 %v5909_v15, %v5908_v23  ;;  %v5911_v17 = vpop.f32.mrb[46].mxu1 }
 0x36b   : > { %v5912_v32 = vpop.f32.mrb[47].mxu1 }
 0x36c   : > { %v4920_v34 = vadd.f32 %v5910_v26, %v4880_v0 }
 0x379   : > { %v4959_v19 = vpop.f32.mrb[4].mxu0 }
 0x37a   : > { %v4960_v20 = vadd.f32 %v4959_v19, %v4920_v34  ;;  %v5935_v38 = vpop.f32.mrb[5].mxu0 }
 0x37b   : > { %v4962_v21 = vpop.f32.mrb[6].mxu0 }
 0x37c   : > { %v4967_v24 = vmax.f32 %v4960_v20, 0.0  ;;  %v5936_v27 = vpop.f32.mrb[7].mxu0 }
 0x37e   : > { %4970 = vst [vmem:[%s236_s9 + $0x10] sm:$0xff] %v4967_v24 }
 0x37f   : > { %6906 = shalt.err (!%p6903_p1)
}
 0x380   : > { %s6907_s11 = scalar_lea.hbm %s7902_s29, 384  ;;  %s6911_s18 = scalar_lea.hbm %s7949_s3, 768 }
 0x381   : > { %p6908_p6 = scmp.ne.s32.totalorder %s7902_s29, %s6907_s11  ;;  %p6912_p7 = scmp.lt.u32.totalorder %s7902_s29, %s7949_s3 }
 0x382   : > { %p6913_p9 = scmp.lt.u32.totalorder %s6911_s18, %s6907_s11  ;;  %p6915_p12 = scmp.lt.u32.totalorder %s6907_s11, %s7902_s29 }
 0x383   : > { %p6909_p4 = pnand %p6908_p6, %p7970_p5 }
 0x384   : > { %p6914_p10 = por %p6913_p9, %p6912_p7 }
 0x385   : > { %p6910_p2 = pneg %p6909_p4 }
 0x386   : > { %p6916_p0 = por %p6915_p12, %p6914_p10 }
 0x388   : > { %p6917_p11 = pnand %p6916_p0, %p6910_p2 }
 0x38a   : > { %6920 = shalt.err (!%p6917_p11)
}
 0x38b   : > { %5995 = dma.vmem_to_hbm [thread:$0]  (%p7970_p5), %s7904_s22, 384, %s7902_s29, %s4972_s6  }
 0x38c PF: > { %s4998_s26 = sand.u32 1, %s6951_s12   ;;  %p7971_p13 = scmp.ne.s32.totalorder %s7960_s28, 0 }
 0x38d   : > { %p7972_p3 = scmp.ge.s32.totalorder %s6963_s15, 2  ;;  %s4999_s4 = scalar_lea.sflag [#allocation4], %s4998_s26 }
 0x38f   : > { %p6009_p8 = pnand %p7972_p3, %p7971_p13 }
 0x391   : > { %6946 = dma.done.wait (!%p6009_p8), %s4999_s4, 384  }
 0x392   : > { %6948 = vsyncadd (!%p6009_p8), %s4999_s4, 4294966912  ;;  %p17_p1 = scmp.ge.s32.totalorder %s7015_s16, 4   ;;  %s7973_s12 = smov %s6955_s13 }
 0x393   : > { %s7974_s13 = smov %s6959_s14  ;;  %s7975_s14 = smov %s7026_s19 }
 0x394   : > { %s7976_s15 = smov %s7015_s16  ;;  %19 = sbr.rel (!%p17_p1) target bundleno = 6 (0x6), region = 93 }
 0x39b   :  { %5004 = vsyncpa [#allocation3], 1 }
 0x39c   :  { %5006 = vsyncpa [#allocation3 + $0x1], 1 }
 0x39d   :  { %5007 = vsyncpa [#allocation6], 1 }
 0x39e   :  { %5009 = vsyncpa [#allocation6 + $0x1], 1 }
 0x39f   :  { %5010 = vsyncpa [#allocation4], 1 }
 0x3a0   :  { %5012 = vsyncpa [#allocation4 + $0x1], 1 }

</bundles_post_ra>
